<compile_context>
chip_gen: v7x
topology: tpu7x:2x2x1
jax: 0.10.0
libtpu: 0.0.40
codegen_flags: <defaults>
</compile_context>

<pallas_src>
import functools

import jax
import jax.numpy as jnp
from jax.experimental import pallas as pl
from jax.experimental.pallas import tpu as pltpu

LRELU_SLOPE = 0.2
BN_EPS = 1e-5


# ----------------------------- Pallas kernels ------------------------------


def _conv_lrelu_kernel(w_ref, p_ref, b_ref, o_ref, *, slope):
    """out = LeakyReLU(W @ P + b); (Cout,K)@(K,M) -> (Cout,M), bf16 store."""
    acc = jnp.dot(w_ref[...], p_ref[...], preferred_element_type=jnp.float32)
    acc = acc + b_ref[...]                          # (Cout,1) broadcast over M
    o_ref[...] = jnp.where(acc >= 0, acc, acc * slope).astype(o_ref.dtype)


def _conv_bn_lrelu_kernel(w_ref, p_ref, g_ref, bt_ref, o_ref, *, slope, eps):
    """out = LeakyReLU(BN(W @ P)); conv bias omitted (cancelled by BN mean)."""
    acc = jnp.dot(w_ref[...], p_ref[...], preferred_element_type=jnp.float32)
    inv_m = 1.0 / float(acc.shape[1])               # full M resident
    mean = jnp.sum(acc, axis=1, keepdims=True) * inv_m
    diff = acc - mean                               # two-pass (biased) variance
    var = jnp.sum(diff * diff, axis=1, keepdims=True) * inv_m
    y = diff * (g_ref[...] * jax.lax.rsqrt(var + eps)) + bt_ref[...]
    o_ref[...] = jnp.where(y >= 0, y, y * slope).astype(o_ref.dtype)


def _tail_kernel(p_ref, w3_ref, g_ref, bt_ref, wl_ref, lb_ref, o_ref, *,
                 slope, eps, n_batch):
    """Fused conv3-as-GEMM + BN + LeakyReLU + Flatten(1) + Linear.

    p_ref : (OH*OW*N, K3) patches, rows ordered (oh, ow, n), cols (c, i, j)
    w3_ref: (K3, C3) conv3 weight (transposed)
    g_ref/bt_ref: (1, C3) BN affine params
    wl_ref: (OH*OW, C3, latent) linear weight with the Flatten permutation folded in
    lb_ref: (1, latent) linear bias
    """
    acc = jnp.dot(p_ref[...], w3_ref[...],
                  preferred_element_type=jnp.float32)        # (M3, C3)
    m = acc.shape[0]
    inv_m = 1.0 / float(m)
    mean = jnp.sum(acc, axis=0, keepdims=True) * inv_m       # per-channel (cols)
    diff = acc - mean
    var = jnp.sum(diff * diff, axis=0, keepdims=True) * inv_m
    y = diff * (g_ref[...] * jax.lax.rsqrt(var + eps)) + bt_ref[...]
    y = jnp.where(y >= 0, y, y * slope)                      # (M3, C3) f32

    npos = m // n_batch                                      # spatial positions
    out = jnp.dot(y[0:n_batch, :], wl_ref[0],
                  preferred_element_type=jnp.float32)        # (N, latent)
    for p in range(1, npos):
        out = out + jnp.dot(y[p * n_batch:(p + 1) * n_batch, :], wl_ref[p],
                            preferred_element_type=jnp.float32)
    o_ref[...] = out + lb_ref[...]


# --------------------------- pallas_call helpers ----------------------------


def _full_spec(a):
    nd = a.ndim
    return pl.BlockSpec(a.shape, lambda i, _nd=nd: (0,) * _nd)


def _single_block_call(kernel, out_shape, out_dtype, *args):
    """One grid step, every operand a full-extent resident block."""
    return pl.pallas_call(
        kernel,
        out_shape=jax.ShapeDtypeStruct(out_shape, out_dtype),
        grid=(1,),
        in_specs=[_full_spec(a) for a in args],
        out_specs=pl.BlockSpec(out_shape,
                               lambda i, _nd=len(out_shape): (0,) * _nd),
        compiler_params=pltpu.CompilerParams(
            dimension_semantics=("arbitrary",)),
    )(*args)


# ------------------------------- JAX glue -----------------------------------


def _im2col_cnhw(x, kh, kw, stride, pad):
    """x: (C, N, H, W) -> patches_T (C*kh*kw, N*OH*OW); rows (c,i,j), cols (n,oh,ow)."""
    xp = jnp.pad(x, ((0, 0), (0, 0), (pad, pad), (pad, pad)))
    c, n, h, w = xp.shape
    oh = (h - kh) // stride + 1
    ow = (w - kw) // stride + 1
    cols = []
    for i in range(kh):
        for j in range(kw):
            cols.append(xp[:, :, i:i + stride * oh:stride,
                           j:j + stride * ow:stride])
    pat = jnp.stack(cols, axis=1)                   # (C, kh*kw, N, OH, OW)
    return pat.reshape(c * kh * kw, n * oh * ow), oh, ow


def _im2col_rows_pn(x, kh, kw, stride, pad):
    """x: (C, N, H, W) -> patches (OH*OW*N, C*kh*kw); rows (oh,ow,n), cols (c,i,j)."""
    xp = jnp.pad(x, ((0, 0), (0, 0), (pad, pad), (pad, pad)))
    c, n, h, w = xp.shape
    oh = (h - kh) // stride + 1
    ow = (w - kw) // stride + 1
    cols = []
    for i in range(kh):
        for j in range(kw):
            cols.append(xp[:, :, i:i + stride * oh:stride,
                           j:j + stride * ow:stride])
    pat = jnp.stack(cols, axis=1)                   # (C, kh*kw, N, OH, OW)
    pat = pat.transpose(3, 4, 2, 0, 1)              # (OH, OW, N, C, kh*kw)
    return pat.reshape(oh * ow * n, c * kh * kw), oh, ow


def init_params(key, in_ch, dims, latent_dim):
    """Mirrors the torch module's parameters (conv biases kept for fidelity)."""
    params = {}
    keys = jax.random.split(key, 16)
    cin = in_ch
    for li, cout in enumerate(dims):
        params[f"conv{li}_w"] = 0.05 * jax.random.normal(
            keys[2 * li], (cout, cin, 4, 4), jnp.float32)
        params[f"conv{li}_b"] = 0.05 * jax.random.normal(
            keys[2 * li + 1], (cout,), jnp.float32)
        if li > 0:                                  # BatchNorm2d default init
            params[f"bn{li}_g"] = jnp.ones((cout,), jnp.float32)
            params[f"bn{li}_b"] = jnp.zeros((cout,), jnp.float32)
        cin = cout
    flat_in = dims[3] * 4 * 4
    params["lin_w"] = 0.05 * jax.random.normal(
        keys[10], (latent_dim, flat_in), jnp.float32)
    params["lin_b"] = 0.05 * jax.random.normal(
        keys[11], (latent_dim,), jnp.float32)
    return params


def prepare_params(params, dims, latent_dim):
    """One-time static preprocessing (reshape / transpose / bf16 cast)."""
    prep = {}
    for li in range(3):                             # layers 0..2: W(Cout,K) @ P(K,M)
        cout = dims[li]
        prep[f"w{li}"] = params[f"conv{li}_w"].reshape(cout, -1).astype(jnp.bfloat16)
    prep["b0"] = params["conv0_b"].astype(jnp.float32).reshape(dims[0], 1)
    # Conv biases of BN layers are dropped: exactly cancelled by BN mean subtraction.
    for li in (1, 2):
        cout = dims[li]
        prep[f"g{li}"] = params[f"bn{li}_g"].astype(jnp.float32).reshape(cout, 1)
        prep[f"bt{li}"] = params[f"bn{li}_b"].astype(jnp.float32).reshape(cout, 1)
    # Tail kernel: P(M3,K3) @ W3T(K3,C3); channels land on lanes.
    c3 = dims[3]
    prep["w3T"] = params["conv3_w"].reshape(c3, -1).T.astype(jnp.bfloat16)
    prep["g3"] = params["bn3_g"].astype(jnp.float32).reshape(1, c3)
    prep["bt3"] = params["bn3_b"].astype(jnp.float32).reshape(1, c3)
    # Fold torch Flatten(1) ordering (f = c*16 + oh*4 + ow) into the linear weight:
    # wl[p, c, d] = lin_w[d, c*16 + p]
    wl = params["lin_w"].reshape(latent_dim, c3, 16).transpose(2, 1, 0)
    prep["wl"] = wl.astype(jnp.float32)             # (16, C3, latent)
    prep["lb"] = params["lin_b"].astype(jnp.float32).reshape(1, latent_dim)
    return prep


def encoder_forward(img, prep, dims):
    """img: (N, C, H, W) float32; returns (N, latent_dim) float32."""
    n = img.shape[0]
    x = img.astype(jnp.bfloat16).transpose(1, 0, 2, 3)      # NCHW -> CNHW, bf16, once

    # layer 0: conv + bias + LeakyReLU
    p0, oh, ow = _im2col_cnhw(x, 4, 4, 2, 1)
    out = _single_block_call(
        functools.partial(_conv_lrelu_kernel, slope=LRELU_SLOPE),
        (dims[0], n * oh * ow), jnp.bfloat16, prep["w0"], p0, prep["b0"])
    x = out.reshape(dims[0], n, oh, ow)

    # layers 1, 2: conv + BN(training stats) + LeakyReLU
    for li in (1, 2):
        pT, oh, ow = _im2col_cnhw(x, 4, 4, 2, 1)
        out = _single_block_call(
            functools.partial(_conv_bn_lrelu_kernel, slope=LRELU_SLOPE, eps=BN_EPS),
            (dims[li], n * oh * ow), jnp.bfloat16,
            prep[f"w{li}"], pT, prep[f"g{li}"], prep[f"bt{li}"])
        x = out.reshape(dims[li], n, oh, ow)

    # layer 3 conv + BN + LeakyReLU + Flatten(1) + Linear, fused in one kernel
    p3, oh, ow = _im2col_rows_pn(x, 4, 4, 2, 1)             # (OH*OW*N, C2*16) bf16
    lat = prep["lb"].shape[1]
    return _single_block_call(
        functools.partial(_tail_kernel, slope=LRELU_SLOPE, eps=BN_EPS, n_batch=n),
        (n, lat), jnp.float32,
        p3, prep["w3T"], prep["g3"], prep["bt3"], prep["wl"], prep["lb"])


# --------------------------------- main --------------------------------------

if __name__ == "__main__":
    key = jax.random.PRNGKey(0)
    k_img, k_par = jax.random.split(key)

    batch, in_ch, img_hw = 2, 3, 64          # 64x64 -> 4x4 after four stride-2 convs
    dims = [8, 16, 32, 64]                   # small BaseEncoder.dims
    latent_dim = 16

    img = jax.random.normal(k_img, (batch, in_ch, img_hw, img_hw), jnp.float32)
    params = init_params(k_par, in_ch, dims, latent_dim)
    prep = prepare_params(params, dims, latent_dim)   # one-time static prep

    fwd = jax.jit(functools.partial(encoder_forward, dims=dims))
    out = fwd(img, prep)
    jax.block_until_ready(out)

    assert out.shape == (batch, latent_dim), out.shape
    assert bool(jnp.all(jnp.isfinite(out)))
    print("KERNEL_OK")
</pallas_src>

<mosaic_0001>
module attributes {stable_mosaic.version = 11 : i64} {
  func.func @_conv_lrelu_kernel(%arg0: i32, %arg1: memref<8x48xbf16, #tpu.memory_space<vmem>>, %arg2: memref<48x2048xbf16, #tpu.memory_space<vmem>>, %arg3: memref<8x1xf32, #tpu.memory_space<vmem>>, %arg4: memref<8x2048xbf16, #tpu.memory_space<vmem>>) attributes {dimension_semantics = [#tpu.dimension_semantics<arbitrary>], iteration_bounds = array<i64: 1>, scalar_prefetch = 0 : i64, scratch_operands = 0 : i64, tpu.core_type = #tpu.core_type<tc>, window_params = [{pipeline_mode = #tpu.pipeline_mode<synchronous>, transform_indices = @transform_0, window_bounds = array<i64: 8, 48>}, {pipeline_mode = #tpu.pipeline_mode<synchronous>, transform_indices = @transform_1, window_bounds = array<i64: 48, 2048>}, {pipeline_mode = #tpu.pipeline_mode<synchronous>, transform_indices = @transform_2, window_bounds = array<i64: 8, 1>}, {pipeline_mode = #tpu.pipeline_mode<synchronous>, transform_indices = @transform_3, window_bounds = array<i64: 8, 2048>}]} {
    %c0 = arith.constant 0 : index
    %c0_0 = arith.constant 0 : index
    %0 = vector.load %arg1[%c0, %c0_0] : memref<8x48xbf16, #tpu.memory_space<vmem>>, vector<8x48xbf16>
    %c0_1 = arith.constant 0 : index
    %c0_2 = arith.constant 0 : index
    %1 = vector.load %arg2[%c0_1, %c0_2] : memref<48x2048xbf16, #tpu.memory_space<vmem>>, vector<48x2048xbf16>
    %cst = arith.constant dense<0.000000e+00> : vector<8x2048xf32>
    %2 = tpu.matmul %0, %1, %cst {dimension_numbers = #tpu.dot_dimension_numbers<[1], [0], [0], [1], [0, 0, 1, 1], [], []>} : vector<8x48xbf16>, vector<48x2048xbf16>, vector<8x2048xf32> -> vector<8x2048xf32>
    %c0_3 = arith.constant 0 : index
    %c0_4 = arith.constant 0 : index
    %3 = vector.load %arg3[%c0_3, %c0_4] : memref<8x1xf32, #tpu.memory_space<vmem>>, vector<8x1xf32>
    %4 = vector.broadcast %3 : vector<8x1xf32> to vector<8x2048xf32>
    %5 = arith.addf %2, %4 : vector<8x2048xf32>
    %cst_5 = arith.constant 0.000000e+00 : f32
    %6 = vector.broadcast %cst_5 : f32 to vector<8x2048xf32>
    %7 = arith.cmpf oge, %5, %6 : vector<8x2048xf32>
    %cst_6 = arith.constant 2.000000e-01 : f32
    %8 = vector.broadcast %cst_6 : f32 to vector<8x2048xf32>
    %9 = arith.mulf %5, %8 : vector<8x2048xf32>
    %10 = arith.select %7, %5, %9 : vector<8x2048xi1>, vector<8x2048xf32>
    %11 = arith.truncf %10 : vector<8x2048xf32> to vector<8x2048xbf16>
    %c0_7 = arith.constant 0 : index
    %c0_8 = arith.constant 0 : index
    %12 = vector.load %arg4[%c0_7, %c0_8] : memref<8x2048xbf16, #tpu.memory_space<vmem>>, vector<8x2048xbf16>
    tpu.vector_store %arg4[%c0_7, %c0_8], %11 {strides = array<i32>} : memref<8x2048xbf16, #tpu.memory_space<vmem>>, vector<8x2048xbf16>,
    return
  }
  func.func @transform_0(%arg0: i32) -> (i32, i32) {
    %c0_i32 = arith.constant 0 : i32
    %c0_i32_0 = arith.constant 0 : i32
    %c0_i32_1 = arith.constant 0 : i32
    return %c0_i32, %c0_i32_0 : i32, i32
  }
  func.func @transform_1(%arg0: i32) -> (i32, i32) {
    %c0_i32 = arith.constant 0 : i32
    %c0_i32_0 = arith.constant 0 : i32
    %c0_i32_1 = arith.constant 0 : i32
    return %c0_i32, %c0_i32_0 : i32, i32
  }
  func.func @transform_2(%arg0: i32) -> (i32, i32) {
    %c0_i32 = arith.constant 0 : i32
    %c0_i32_0 = arith.constant 0 : i32
    %c0_i32_1 = arith.constant 0 : i32
    return %c0_i32, %c0_i32_0 : i32, i32
  }
  func.func @transform_3(%arg0: i32) -> (i32, i32) {
    %c0_i32 = arith.constant 0 : i32
    %c0_i32_0 = arith.constant 0 : i32
    %c0_i32_1 = arith.constant 0 : i32
    return %c0_i32, %c0_i32_0 : i32, i32
  }
}

module attributes {stable_mosaic.version = 11 : i64} {
  func.func @_conv_bn_lrelu_kernel(%arg0: i32, %arg1: memref<16x128xbf16, #tpu.memory_space<vmem>>, %arg2: memref<128x512xbf16, #tpu.memory_space<vmem>>, %arg3: memref<16x1xf32, #tpu.memory_space<vmem>>, %arg4: memref<16x1xf32, #tpu.memory_space<vmem>>, %arg5: memref<16x512xbf16, #tpu.memory_space<vmem>>) attributes {dimension_semantics = [#tpu.dimension_semantics<arbitrary>], iteration_bounds = array<i64: 1>, scalar_prefetch = 0 : i64, scratch_operands = 0 : i64, tpu.core_type = #tpu.core_type<tc>, window_params = [{pipeline_mode = #tpu.pipeline_mode<synchronous>, transform_indices = @transform_0, window_bounds = array<i64: 16, 128>}, {pipeline_mode = #tpu.pipeline_mode<synchronous>, transform_indices = @transform_1, window_bounds = array<i64: 128, 512>}, {pipeline_mode = #tpu.pipeline_mode<synchronous>, transform_indices = @transform_2, window_bounds = array<i64: 16, 1>}, {pipeline_mode = #tpu.pipeline_mode<synchronous>, transform_indices = @transform_3, window_bounds = array<i64: 16, 1>}, {pipeline_mode = #tpu.pipeline_mode<synchronous>, transform_indices = @transform_4, window_bounds = array<i64: 16, 512>}]} {
    %c0 = arith.constant 0 : index
    %c0_0 = arith.constant 0 : index
    %0 = vector.load %arg1[%c0, %c0_0] : memref<16x128xbf16, #tpu.memory_space<vmem>>, vector<16x128xbf16>
    %c0_1 = arith.constant 0 : index
    %c0_2 = arith.constant 0 : index
    %1 = vector.load %arg2[%c0_1, %c0_2] : memref<128x512xbf16, #tpu.memory_space<vmem>>, vector<128x512xbf16>
    %cst = arith.constant dense<0.000000e+00> : vector<16x512xf32>
    %2 = tpu.matmul %0, %1, %cst {dimension_numbers = #tpu.dot_dimension_numbers<[1], [0], [0], [1], [0, 0, 1, 1], [], []>} : vector<16x128xbf16>, vector<128x512xbf16>, vector<16x512xf32> -> vector<16x512xf32>
    %cst_3 = arith.constant dense<0.000000e+00> : vector<16xf32>
    %3 = vector.multi_reduction <add>, %2, %cst_3 [1] : vector<16x512xf32> to vector<16xf32>
    %4 = vector.shape_cast %3 : vector<16xf32> to vector<16x1xf32>
    %cst_4 = arith.constant 0.001953125 : f32
    %5 = vector.broadcast %cst_4 : f32 to vector<16x1xf32>
    %6 = arith.mulf %4, %5 : vector<16x1xf32>
    %7 = vector.broadcast %6 : vector<16x1xf32> to vector<16x512xf32>
    %8 = arith.subf %2, %7 : vector<16x512xf32>
    %9 = arith.mulf %8, %8 : vector<16x512xf32>
    %cst_5 = arith.constant dense<0.000000e+00> : vector<16xf32>
    %10 = vector.multi_reduction <add>, %9, %cst_5 [1] : vector<16x512xf32> to vector<16xf32>
    %11 = vector.shape_cast %10 : vector<16xf32> to vector<16x1xf32>
    %cst_6 = arith.constant 0.001953125 : f32
    %12 = vector.broadcast %cst_6 : f32 to vector<16x1xf32>
    %13 = arith.mulf %11, %12 : vector<16x1xf32>
    %c0_7 = arith.constant 0 : index
    %c0_8 = arith.constant 0 : index
    %14 = vector.load %arg3[%c0_7, %c0_8] : memref<16x1xf32, #tpu.memory_space<vmem>>, vector<16x1xf32>
    %cst_9 = arith.constant 9.99999974E-6 : f32
    %15 = vector.broadcast %cst_9 : f32 to vector<16x1xf32>
    %16 = arith.addf %13, %15 : vector<16x1xf32>
    %17 = math.rsqrt %16 : vector<16x1xf32>
    %18 = arith.mulf %14, %17 : vector<16x1xf32>
    %19 = vector.broadcast %18 : vector<16x1xf32> to vector<16x512xf32>
    %20 = arith.mulf %8, %19 : vector<16x512xf32>
    %c0_10 = arith.constant 0 : index
    %c0_11 = arith.constant 0 : index
    %21 = vector.load %arg4[%c0_10, %c0_11] : memref<16x1xf32, #tpu.memory_space<vmem>>, vector<16x1xf32>
    %22 = vector.broadcast %21 : vector<16x1xf32> to vector<16x512xf32>
    %23 = arith.addf %20, %22 : vector<16x512xf32>
    %cst_12 = arith.constant 0.000000e+00 : f32
    %24 = vector.broadcast %cst_12 : f32 to vector<16x512xf32>
    %25 = arith.cmpf oge, %23, %24 : vector<16x512xf32>
    %cst_13 = arith.constant 2.000000e-01 : f32
    %26 = vector.broadcast %cst_13 : f32 to vector<16x512xf32>
    %27 = arith.mulf %23, %26 : vector<16x512xf32>
    %28 = arith.select %25, %23, %27 : vector<16x512xi1>, vector<16x512xf32>
    %29 = arith.truncf %28 : vector<16x512xf32> to vector<16x512xbf16>
    %c0_14 = arith.constant 0 : index
    %c0_15 = arith.constant 0 : index
    %30 = vector.load %arg5[%c0_14, %c0_15] : memref<16x512xbf16, #tpu.memory_space<vmem>>, vector<16x512xbf16>
    tpu.vector_store %arg5[%c0_14, %c0_15], %29 {strides = array<i32>} : memref<16x512xbf16, #tpu.memory_space<vmem>>, vector<16x512xbf16>,
    return
  }
  func.func @transform_0(%arg0: i32) -> (i32, i32) {
    %c0_i32 = arith.constant 0 : i32
    %c0_i32_0 = arith.constant 0 : i32
    %c0_i32_1 = arith.constant 0 : i32
    return %c0_i32, %c0_i32_0 : i32, i32
  }
  func.func @transform_1(%arg0: i32) -> (i32, i32) {
    %c0_i32 = arith.constant 0 : i32
    %c0_i32_0 = arith.constant 0 : i32
    %c0_i32_1 = arith.constant 0 : i32
    return %c0_i32, %c0_i32_0 : i32, i32
  }
  func.func @transform_2(%arg0: i32) -> (i32, i32) {
    %c0_i32 = arith.constant 0 : i32
    %c0_i32_0 = arith.constant 0 : i32
    %c0_i32_1 = arith.constant 0 : i32
    return %c0_i32, %c0_i32_0 : i32, i32
  }
  func.func @transform_3(%arg0: i32) -> (i32, i32) {
    %c0_i32 = arith.constant 0 : i32
    %c0_i32_0 = arith.constant 0 : i32
    %c0_i32_1 = arith.constant 0 : i32
    return %c0_i32, %c0_i32_0 : i32, i32
  }
  func.func @transform_4(%arg0: i32) -> (i32, i32) {
    %c0_i32 = arith.constant 0 : i32
    %c0_i32_0 = arith.constant 0 : i32
    %c0_i32_1 = arith.constant 0 : i32
    return %c0_i32, %c0_i32_0 : i32, i32
  }
}

module attributes {stable_mosaic.version = 11 : i64} {
  func.func @_conv_bn_lrelu_kernel(%arg0: i32, %arg1: memref<32x256xbf16, #tpu.memory_space<vmem>>, %arg2: memref<256x128xbf16, #tpu.memory_space<vmem>>, %arg3: memref<32x1xf32, #tpu.memory_space<vmem>>, %arg4: memref<32x1xf32, #tpu.memory_space<vmem>>, %arg5: memref<32x128xbf16, #tpu.memory_space<vmem>>) attributes {dimension_semantics = [#tpu.dimension_semantics<arbitrary>], iteration_bounds = array<i64: 1>, scalar_prefetch = 0 : i64, scratch_operands = 0 : i64, tpu.core_type = #tpu.core_type<tc>, window_params = [{pipeline_mode = #tpu.pipeline_mode<synchronous>, transform_indices = @transform_0, window_bounds = array<i64: 32, 256>}, {pipeline_mode = #tpu.pipeline_mode<synchronous>, transform_indices = @transform_1, window_bounds = array<i64: 256, 128>}, {pipeline_mode = #tpu.pipeline_mode<synchronous>, transform_indices = @transform_2, window_bounds = array<i64: 32, 1>}, {pipeline_mode = #tpu.pipeline_mode<synchronous>, transform_indices = @transform_3, window_bounds = array<i64: 32, 1>}, {pipeline_mode = #tpu.pipeline_mode<synchronous>, transform_indices = @transform_4, window_bounds = array<i64: 32, 128>}]} {
    %c0 = arith.constant 0 : index
    %c0_0 = arith.constant 0 : index
    %0 = vector.load %arg1[%c0, %c0_0] : memref<32x256xbf16, #tpu.memory_space<vmem>>, vector<32x256xbf16>
    %c0_1 = arith.constant 0 : index
    %c0_2 = arith.constant 0 : index
    %1 = vector.load %arg2[%c0_1, %c0_2] : memref<256x128xbf16, #tpu.memory_space<vmem>>, vector<256x128xbf16>
    %cst = arith.constant dense<0.000000e+00> : vector<32x128xf32>
    %2 = tpu.matmul %0, %1, %cst {dimension_numbers = #tpu.dot_dimension_numbers<[1], [0], [0], [1], [0, 0, 1, 1], [], []>} : vector<32x256xbf16>, vector<256x128xbf16>, vector<32x128xf32> -> vector<32x128xf32>
    %cst_3 = arith.constant dense<0.000000e+00> : vector<32xf32>
    %3 = vector.multi_reduction <add>, %2, %cst_3 [1] : vector<32x128xf32> to vector<32xf32>
    %4 = vector.shape_cast %3 : vector<32xf32> to vector<32x1xf32>
    %cst_4 = arith.constant 7.812500e-03 : f32
    %5 = vector.broadcast %cst_4 : f32 to vector<32x1xf32>
    %6 = arith.mulf %4, %5 : vector<32x1xf32>
    %7 = vector.broadcast %6 : vector<32x1xf32> to vector<32x128xf32>
    %8 = arith.subf %2, %7 : vector<32x128xf32>
    %9 = arith.mulf %8, %8 : vector<32x128xf32>
    %cst_5 = arith.constant dense<0.000000e+00> : vector<32xf32>
    %10 = vector.multi_reduction <add>, %9, %cst_5 [1] : vector<32x128xf32> to vector<32xf32>
    %11 = vector.shape_cast %10 : vector<32xf32> to vector<32x1xf32>
    %cst_6 = arith.constant 7.812500e-03 : f32
    %12 = vector.broadcast %cst_6 : f32 to vector<32x1xf32>
    %13 = arith.mulf %11, %12 : vector<32x1xf32>
    %c0_7 = arith.constant 0 : index
    %c0_8 = arith.constant 0 : index
    %14 = vector.load %arg3[%c0_7, %c0_8] : memref<32x1xf32, #tpu.memory_space<vmem>>, vector<32x1xf32>
    %cst_9 = arith.constant 9.99999974E-6 : f32
    %15 = vector.broadcast %cst_9 : f32 to vector<32x1xf32>
    %16 = arith.addf %13, %15 : vector<32x1xf32>
    %17 = math.rsqrt %16 : vector<32x1xf32>
    %18 = arith.mulf %14, %17 : vector<32x1xf32>
    %19 = vector.broadcast %18 : vector<32x1xf32> to vector<32x128xf32>
    %20 = arith.mulf %8, %19 : vector<32x128xf32>
    %c0_10 = arith.constant 0 : index
    %c0_11 = arith.constant 0 : index
    %21 = vector.load %arg4[%c0_10, %c0_11] : memref<32x1xf32, #tpu.memory_space<vmem>>, vector<32x1xf32>
    %22 = vector.broadcast %21 : vector<32x1xf32> to vector<32x128xf32>
    %23 = arith.addf %20, %22 : vector<32x128xf32>
    %cst_12 = arith.constant 0.000000e+00 : f32
    %24 = vector.broadcast %cst_12 : f32 to vector<32x128xf32>
    %25 = arith.cmpf oge, %23, %24 : vector<32x128xf32>
    %cst_13 = arith.constant 2.000000e-01 : f32
    %26 = vector.broadcast %cst_13 : f32 to vector<32x128xf32>
    %27 = arith.mulf %23, %26 : vector<32x128xf32>
    %28 = arith.select %25, %23, %27 : vector<32x128xi1>, vector<32x128xf32>
    %29 = arith.truncf %28 : vector<32x128xf32> to vector<32x128xbf16>
    %c0_14 = arith.constant 0 : index
    %c0_15 = arith.constant 0 : index
    %30 = vector.load %arg5[%c0_14, %c0_15] : memref<32x128xbf16, #tpu.memory_space<vmem>>, vector<32x128xbf16>
    tpu.vector_store %arg5[%c0_14, %c0_15], %29 {strides = array<i32>} : memref<32x128xbf16, #tpu.memory_space<vmem>>, vector<32x128xbf16>,
    return
  }
  func.func @transform_0(%arg0: i32) -> (i32, i32) {
    %c0_i32 = arith.constant 0 : i32
    %c0_i32_0 = arith.constant 0 : i32
    %c0_i32_1 = arith.constant 0 : i32
    return %c0_i32, %c0_i32_0 : i32, i32
  }
  func.func @transform_1(%arg0: i32) -> (i32, i32) {
    %c0_i32 = arith.constant 0 : i32
    %c0_i32_0 = arith.constant 0 : i32
    %c0_i32_1 = arith.constant 0 : i32
    return %c0_i32, %c0_i32_0 : i32, i32
  }
  func.func @transform_2(%arg0: i32) -> (i32, i32) {
    %c0_i32 = arith.constant 0 : i32
    %c0_i32_0 = arith.constant 0 : i32
    %c0_i32_1 = arith.constant 0 : i32
    return %c0_i32, %c0_i32_0 : i32, i32
  }
  func.func @transform_3(%arg0: i32) -> (i32, i32) {
    %c0_i32 = arith.constant 0 : i32
    %c0_i32_0 = arith.constant 0 : i32
    %c0_i32_1 = arith.constant 0 : i32
    return %c0_i32, %c0_i32_0 : i32, i32
  }
  func.func @transform_4(%arg0: i32) -> (i32, i32) {
    %c0_i32 = arith.constant 0 : i32
    %c0_i32_0 = arith.constant 0 : i32
    %c0_i32_1 = arith.constant 0 : i32
    return %c0_i32, %c0_i32_0 : i32, i32
  }
}

module attributes {stable_mosaic.version = 11 : i64} {
  func.func @_tail_kernel(%arg0: i32, %arg1: memref<32x512xbf16, #tpu.memory_space<vmem>>, %arg2: memref<512x64xbf16, #tpu.memory_space<vmem>>, %arg3: memref<1x64xf32, #tpu.memory_space<vmem>>, %arg4: memref<1x64xf32, #tpu.memory_space<vmem>>, %arg5: memref<16x64x16xf32, #tpu.memory_space<vmem>>, %arg6: memref<1x16xf32, #tpu.memory_space<vmem>>, %arg7: memref<2x16xf32, #tpu.memory_space<vmem>>) attributes {dimension_semantics = [#tpu.dimension_semantics<arbitrary>], iteration_bounds = array<i64: 1>, scalar_prefetch = 0 : i64, scratch_operands = 0 : i64, tpu.core_type = #tpu.core_type<tc>, window_params = [{pipeline_mode = #tpu.pipeline_mode<synchronous>, transform_indices = @transform_0, window_bounds = array<i64: 32, 512>}, {pipeline_mode = #tpu.pipeline_mode<synchronous>, transform_indices = @transform_1, window_bounds = array<i64: 512, 64>}, {pipeline_mode = #tpu.pipeline_mode<synchronous>, transform_indices = @transform_2, window_bounds = array<i64: 1, 64>}, {pipeline_mode = #tpu.pipeline_mode<synchronous>, transform_indices = @transform_3, window_bounds = array<i64: 1, 64>}, {pipeline_mode = #tpu.pipeline_mode<synchronous>, transform_indices = @transform_4, window_bounds = array<i64: 16, 64, 16>}, {pipeline_mode = #tpu.pipeline_mode<synchronous>, transform_indices = @transform_5, window_bounds = array<i64: 1, 16>}, {pipeline_mode = #tpu.pipeline_mode<synchronous>, transform_indices = @transform_6, window_bounds = array<i64: 2, 16>}]} {
    %c0 = arith.constant 0 : index
    %c0_0 = arith.constant 0 : index
    %0 = vector.load %arg1[%c0, %c0_0] : memref<32x512xbf16, #tpu.memory_space<vmem>>, vector<32x512xbf16>
    %c0_1 = arith.constant 0 : index
    %c0_2 = arith.constant 0 : index
    %1 = vector.load %arg2[%c0_1, %c0_2] : memref<512x64xbf16, #tpu.memory_space<vmem>>, vector<512x64xbf16>
    %cst = arith.constant dense<0.000000e+00> : vector<32x64xf32>
    %2 = tpu.matmul %0, %1, %cst {dimension_numbers = #tpu.dot_dimension_numbers<[1], [0], [0], [1], [0, 0, 1, 1], [], []>} : vector<32x512xbf16>, vector<512x64xbf16>, vector<32x64xf32> -> vector<32x64xf32>
    %cst_3 = arith.constant dense<0.000000e+00> : vector<64xf32>
    %3 = vector.multi_reduction <add>, %2, %cst_3 [0] : vector<32x64xf32> to vector<64xf32>
    %4 = vector.shape_cast %3 : vector<64xf32> to vector<1x64xf32>
    %cst_4 = arith.constant 3.125000e-02 : f32
    %5 = vector.broadcast %cst_4 : f32 to vector<1x64xf32>
    %6 = arith.mulf %4, %5 : vector<1x64xf32>
    %7 = vector.broadcast %6 : vector<1x64xf32> to vector<32x64xf32>
    %8 = arith.subf %2, %7 : vector<32x64xf32>
    %9 = arith.mulf %8, %8 : vector<32x64xf32>
    %cst_5 = arith.constant dense<0.000000e+00> : vector<64xf32>
    %10 = vector.multi_reduction <add>, %9, %cst_5 [0] : vector<32x64xf32> to vector<64xf32>
    %11 = vector.shape_cast %10 : vector<64xf32> to vector<1x64xf32>
    %cst_6 = arith.constant 3.125000e-02 : f32
    %12 = vector.broadcast %cst_6 : f32 to vector<1x64xf32>
    %13 = arith.mulf %11, %12 : vector<1x64xf32>
    %c0_7 = arith.constant 0 : index
    %c0_8 = arith.constant 0 : index
    %14 = vector.load %arg3[%c0_7, %c0_8] : memref<1x64xf32, #tpu.memory_space<vmem>>, vector<1x64xf32>
    %cst_9 = arith.constant 9.99999974E-6 : f32
    %15 = vector.broadcast %cst_9 : f32 to vector<1x64xf32>
    %16 = arith.addf %13, %15 : vector<1x64xf32>
    %17 = math.rsqrt %16 : vector<1x64xf32>
    %18 = arith.mulf %14, %17 : vector<1x64xf32>
    %19 = vector.broadcast %18 : vector<1x64xf32> to vector<32x64xf32>
    %20 = arith.mulf %8, %19 : vector<32x64xf32>
    %c0_10 = arith.constant 0 : index
    %c0_11 = arith.constant 0 : index
    %21 = vector.load %arg4[%c0_10, %c0_11] : memref<1x64xf32, #tpu.memory_space<vmem>>, vector<1x64xf32>
    %22 = vector.broadcast %21 : vector<1x64xf32> to vector<32x64xf32>
    %23 = arith.addf %20, %22 : vector<32x64xf32>
    %cst_12 = arith.constant 0.000000e+00 : f32
    %24 = vector.broadcast %cst_12 : f32 to vector<32x64xf32>
    %25 = arith.cmpf oge, %23, %24 : vector<32x64xf32>
    %cst_13 = arith.constant 2.000000e-01 : f32
    %26 = vector.broadcast %cst_13 : f32 to vector<32x64xf32>
    %27 = arith.mulf %23, %26 : vector<32x64xf32>
    %28 = arith.select %25, %23, %27 : vector<32x64xi1>, vector<32x64xf32>
    %29 = vector.extract_strided_slice %28 {offsets = [0, 0], sizes = [2, 64], strides = [1, 1]} : vector<32x64xf32> to vector<2x64xf32>
    %c0_14 = arith.constant 0 : index
    %c0_15 = arith.constant 0 : index
    %c0_16 = arith.constant 0 : index
    %30 = vector.load %arg5[%c0_14, %c0_15, %c0_16] : memref<16x64x16xf32, #tpu.memory_space<vmem>>, vector<1x64x16xf32>
    %31 = vector.shape_cast %30 : vector<1x64x16xf32> to vector<64x16xf32>
    %cst_17 = arith.constant dense<0.000000e+00> : vector<2x16xf32>
    %32 = tpu.matmul %29, %31, %cst_17 {dimension_numbers = #tpu.dot_dimension_numbers<[1], [0], [0], [1], [0, 0, 1, 1], [], []>} : vector<2x64xf32>, vector<64x16xf32>, vector<2x16xf32> -> vector<2x16xf32>
    %33 = vector.extract_strided_slice %28 {offsets = [2, 0], sizes = [2, 64], strides = [1, 1]} : vector<32x64xf32> to vector<2x64xf32>
    %c1 = arith.constant 1 : index
    %c0_18 = arith.constant 0 : index
    %c0_19 = arith.constant 0 : index
    %34 = vector.load %arg5[%c1, %c0_18, %c0_19] : memref<16x64x16xf32, #tpu.memory_space<vmem>>, vector<1x64x16xf32>
    %35 = vector.shape_cast %34 : vector<1x64x16xf32> to vector<64x16xf32>
    %cst_20 = arith.constant dense<0.000000e+00> : vector<2x16xf32>
    %36 = tpu.matmul %33, %35, %cst_20 {dimension_numbers = #tpu.dot_dimension_numbers<[1], [0], [0], [1], [0, 0, 1, 1], [], []>} : vector<2x64xf32>, vector<64x16xf32>, vector<2x16xf32> -> vector<2x16xf32>
    %37 = arith.addf %32, %36 : vector<2x16xf32>
    %38 = vector.extract_strided_slice %28 {offsets = [4, 0], sizes = [2, 64], strides = [1, 1]} : vector<32x64xf32> to vector<2x64xf32>
    %c2 = arith.constant 2 : index
    %c0_21 = arith.constant 0 : index
    %c0_22 = arith.constant 0 : index
    %39 = vector.load %arg5[%c2, %c0_21, %c0_22] : memref<16x64x16xf32, #tpu.memory_space<vmem>>, vector<1x64x16xf32>
    %40 = vector.shape_cast %39 : vector<1x64x16xf32> to vector<64x16xf32>
    %cst_23 = arith.constant dense<0.000000e+00> : vector<2x16xf32>
    %41 = tpu.matmul %38, %40, %cst_23 {dimension_numbers = #tpu.dot_dimension_numbers<[1], [0], [0], [1], [0, 0, 1, 1], [], []>} : vector<2x64xf32>, vector<64x16xf32>, vector<2x16xf32> -> vector<2x16xf32>
    %42 = arith.addf %37, %41 : vector<2x16xf32>
    %43 = vector.extract_strided_slice %28 {offsets = [6, 0], sizes = [2, 64], strides = [1, 1]} : vector<32x64xf32> to vector<2x64xf32>
    %c3 = arith.constant 3 : index
    %c0_24 = arith.constant 0 : index
    %c0_25 = arith.constant 0 : index
    %44 = vector.load %arg5[%c3, %c0_24, %c0_25] : memref<16x64x16xf32, #tpu.memory_space<vmem>>, vector<1x64x16xf32>
    %45 = vector.shape_cast %44 : vector<1x64x16xf32> to vector<64x16xf32>
    %cst_26 = arith.constant dense<0.000000e+00> : vector<2x16xf32>
    %46 = tpu.matmul %43, %45, %cst_26 {dimension_numbers = #tpu.dot_dimension_numbers<[1], [0], [0], [1], [0, 0, 1, 1], [], []>} : vector<2x64xf32>, vector<64x16xf32>, vector<2x16xf32> -> vector<2x16xf32>
    %47 = arith.addf %42, %46 : vector<2x16xf32>
    %48 = vector.extract_strided_slice %28 {offsets = [8, 0], sizes = [2, 64], strides = [1, 1]} : vector<32x64xf32> to vector<2x64xf32>
    %c4 = arith.constant 4 : index
    %c0_27 = arith.constant 0 : index
    %c0_28 = arith.constant 0 : index
    %49 = vector.load %arg5[%c4, %c0_27, %c0_28] : memref<16x64x16xf32, #tpu.memory_space<vmem>>, vector<1x64x16xf32>
    %50 = vector.shape_cast %49 : vector<1x64x16xf32> to vector<64x16xf32>
    %cst_29 = arith.constant dense<0.000000e+00> : vector<2x16xf32>
    %51 = tpu.matmul %48, %50, %cst_29 {dimension_numbers = #tpu.dot_dimension_numbers<[1], [0], [0], [1], [0, 0, 1, 1], [], []>} : vector<2x64xf32>, vector<64x16xf32>, vector<2x16xf32> -> vector<2x16xf32>
    %52 = arith.addf %47, %51 : vector<2x16xf32>
    %53 = vector.extract_strided_slice %28 {offsets = [10, 0], sizes = [2, 64], strides = [1, 1]} : vector<32x64xf32> to vector<2x64xf32>
    %c5 = arith.constant 5 : index
    %c0_30 = arith.constant 0 : index
    %c0_31 = arith.constant 0 : index
    %54 = vector.load %arg5[%c5, %c0_30, %c0_31] : memref<16x64x16xf32, #tpu.memory_space<vmem>>, vector<1x64x16xf32>
    %55 = vector.shape_cast %54 : vector<1x64x16xf32> to vector<64x16xf32>
    %cst_32 = arith.constant dense<0.000000e+00> : vector<2x16xf32>
    %56 = tpu.matmul %53, %55, %cst_32 {dimension_numbers = #tpu.dot_dimension_numbers<[1], [0], [0], [1], [0, 0, 1, 1], [], []>} : vector<2x64xf32>, vector<64x16xf32>, vector<2x16xf32> -> vector<2x16xf32>
    %57 = arith.addf %52, %56 : vector<2x16xf32>
    %58 = vector.extract_strided_slice %28 {offsets = [12, 0], sizes = [2, 64], strides = [1, 1]} : vector<32x64xf32> to vector<2x64xf32>
    %c6 = arith.constant 6 : index
    %c0_33 = arith.constant 0 : index
    %c0_34 = arith.constant 0 : index
    %59 = vector.load %arg5[%c6, %c0_33, %c0_34] : memref<16x64x16xf32, #tpu.memory_space<vmem>>, vector<1x64x16xf32>
    %60 = vector.shape_cast %59 : vector<1x64x16xf32> to vector<64x16xf32>
    %cst_35 = arith.constant dense<0.000000e+00> : vector<2x16xf32>
    %61 = tpu.matmul %58, %60, %cst_35 {dimension_numbers = #tpu.dot_dimension_numbers<[1], [0], [0], [1], [0, 0, 1, 1], [], []>} : vector<2x64xf32>, vector<64x16xf32>, vector<2x16xf32> -> vector<2x16xf32>
    %62 = arith.addf %57, %61 : vector<2x16xf32>
    %63 = vector.extract_strided_slice %28 {offsets = [14, 0], sizes = [2, 64], strides = [1, 1]} : vector<32x64xf32> to vector<2x64xf32>
    %c7 = arith.constant 7 : index
    %c0_36 = arith.constant 0 : index
    %c0_37 = arith.constant 0 : index
    %64 = vector.load %arg5[%c7, %c0_36, %c0_37] : memref<16x64x16xf32, #tpu.memory_space<vmem>>, vector<1x64x16xf32>
    %65 = vector.shape_cast %64 : vector<1x64x16xf32> to vector<64x16xf32>
    %cst_38 = arith.constant dense<0.000000e+00> : vector<2x16xf32>
    %66 = tpu.matmul %63, %65, %cst_38 {dimension_numbers = #tpu.dot_dimension_numbers<[1], [0], [0], [1], [0, 0, 1, 1], [], []>} : vector<2x64xf32>, vector<64x16xf32>, vector<2x16xf32> -> vector<2x16xf32>
    %67 = arith.addf %62, %66 : vector<2x16xf32>
    %68 = vector.extract_strided_slice %28 {offsets = [16, 0], sizes = [2, 64], strides = [1, 1]} : vector<32x64xf32> to vector<2x64xf32>
    %c8 = arith.constant 8 : index
    %c0_39 = arith.constant 0 : index
    %c0_40 = arith.constant 0 : index
    %69 = vector.load %arg5[%c8, %c0_39, %c0_40] : memref<16x64x16xf32, #tpu.memory_space<vmem>>, vector<1x64x16xf32>
    %70 = vector.shape_cast %69 : vector<1x64x16xf32> to vector<64x16xf32>
    %cst_41 = arith.constant dense<0.000000e+00> : vector<2x16xf32>
    %71 = tpu.matmul %68, %70, %cst_41 {dimension_numbers = #tpu.dot_dimension_numbers<[1], [0], [0], [1], [0, 0, 1, 1], [], []>} : vector<2x64xf32>, vector<64x16xf32>, vector<2x16xf32> -> vector<2x16xf32>
    %72 = arith.addf %67, %71 : vector<2x16xf32>
    %73 = vector.extract_strided_slice %28 {offsets = [18, 0], sizes = [2, 64], strides = [1, 1]} : vector<32x64xf32> to vector<2x64xf32>
    %c9 = arith.constant 9 : index
    %c0_42 = arith.constant 0 : index
    %c0_43 = arith.constant 0 : index
    %74 = vector.load %arg5[%c9, %c0_42, %c0_43] : memref<16x64x16xf32, #tpu.memory_space<vmem>>, vector<1x64x16xf32>
    %75 = vector.shape_cast %74 : vector<1x64x16xf32> to vector<64x16xf32>
    %cst_44 = arith.constant dense<0.000000e+00> : vector<2x16xf32>
    %76 = tpu.matmul %73, %75, %cst_44 {dimension_numbers = #tpu.dot_dimension_numbers<[1], [0], [0], [1], [0, 0, 1, 1], [], []>} : vector<2x64xf32>, vector<64x16xf32>, vector<2x16xf32> -> vector<2x16xf32>
    %77 = arith.addf %72, %76 : vector<2x16xf32>
    %78 = vector.extract_strided_slice %28 {offsets = [20, 0], sizes = [2, 64], strides = [1, 1]} : vector<32x64xf32> to vector<2x64xf32>
    %c10 = arith.constant 10 : index
    %c0_45 = arith.constant 0 : index
    %c0_46 = arith.constant 0 : index
    %79 = vector.load %arg5[%c10, %c0_45, %c0_46] : memref<16x64x16xf32, #tpu.memory_space<vmem>>, vector<1x64x16xf32>
    %80 = vector.shape_cast %79 : vector<1x64x16xf32> to vector<64x16xf32>
    %cst_47 = arith.constant dense<0.000000e+00> : vector<2x16xf32>
    %81 = tpu.matmul %78, %80, %cst_47 {dimension_numbers = #tpu.dot_dimension_numbers<[1], [0], [0], [1], [0, 0, 1, 1], [], []>} : vector<2x64xf32>, vector<64x16xf32>, vector<2x16xf32> -> vector<2x16xf32>
    %82 = arith.addf %77, %81 : vector<2x16xf32>
    %83 = vector.extract_strided_slice %28 {offsets = [22, 0], sizes = [2, 64], strides = [1, 1]} : vector<32x64xf32> to vector<2x64xf32>
    %c11 = arith.constant 11 : index
    %c0_48 = arith.constant 0 : index
    %c0_49 = arith.constant 0 : index
    %84 = vector.load %arg5[%c11, %c0_48, %c0_49] : memref<16x64x16xf32, #tpu.memory_space<vmem>>, vector<1x64x16xf32>
    %85 = vector.shape_cast %84 : vector<1x64x16xf32> to vector<64x16xf32>
    %cst_50 = arith.constant dense<0.000000e+00> : vector<2x16xf32>
    %86 = tpu.matmul %83, %85, %cst_50 {dimension_numbers = #tpu.dot_dimension_numbers<[1], [0], [0], [1], [0, 0, 1, 1], [], []>} : vector<2x64xf32>, vector<64x16xf32>, vector<2x16xf32> -> vector<2x16xf32>
    %87 = arith.addf %82, %86 : vector<2x16xf32>
    %88 = vector.extract_strided_slice %28 {offsets = [24, 0], sizes = [2, 64], strides = [1, 1]} : vector<32x64xf32> to vector<2x64xf32>
    %c12 = arith.constant 12 : index
    %c0_51 = arith.constant 0 : index
    %c0_52 = arith.constant 0 : index
    %89 = vector.load %arg5[%c12, %c0_51, %c0_52] : memref<16x64x16xf32, #tpu.memory_space<vmem>>, vector<1x64x16xf32>
    %90 = vector.shape_cast %89 : vector<1x64x16xf32> to vector<64x16xf32>
    %cst_53 = arith.constant dense<0.000000e+00> : vector<2x16xf32>
    %91 = tpu.matmul %88, %90, %cst_53 {dimension_numbers = #tpu.dot_dimension_numbers<[1], [0], [0], [1], [0, 0, 1, 1], [], []>} : vector<2x64xf32>, vector<64x16xf32>, vector<2x16xf32> -> vector<2x16xf32>
    %92 = arith.addf %87, %91 : vector<2x16xf32>
    %93 = vector.extract_strided_slice %28 {offsets = [26, 0], sizes = [2, 64], strides = [1, 1]} : vector<32x64xf32> to vector<2x64xf32>
    %c13 = arith.constant 13 : index
    %c0_54 = arith.constant 0 : index
    %c0_55 = arith.constant 0 : index
    %94 = vector.load %arg5[%c13, %c0_54, %c0_55] : memref<16x64x16xf32, #tpu.memory_space<vmem>>, vector<1x64x16xf32>
    %95 = vector.shape_cast %94 : vector<1x64x16xf32> to vector<64x16xf32>
    %cst_56 = arith.constant dense<0.000000e+00> : vector<2x16xf32>
    %96 = tpu.matmul %93, %95, %cst_56 {dimension_numbers = #tpu.dot_dimension_numbers<[1], [0], [0], [1], [0, 0, 1, 1], [], []>} : vector<2x64xf32>, vector<64x16xf32>, vector<2x16xf32> -> vector<2x16xf32>
    %97 = arith.addf %92, %96 : vector<2x16xf32>
    %98 = vector.extract_strided_slice %28 {offsets = [28, 0], sizes = [2, 64], strides = [1, 1]} : vector<32x64xf32> to vector<2x64xf32>
    %c14 = arith.constant 14 : index
    %c0_57 = arith.constant 0 : index
    %c0_58 = arith.constant 0 : index
    %99 = vector.load %arg5[%c14, %c0_57, %c0_58] : memref<16x64x16xf32, #tpu.memory_space<vmem>>, vector<1x64x16xf32>
    %100 = vector.shape_cast %99 : vector<1x64x16xf32> to vector<64x16xf32>
    %cst_59 = arith.constant dense<0.000000e+00> : vector<2x16xf32>
    %101 = tpu.matmul %98, %100, %cst_59 {dimension_numbers = #tpu.dot_dimension_numbers<[1], [0], [0], [1], [0, 0, 1, 1], [], []>} : vector<2x64xf32>, vector<64x16xf32>, vector<2x16xf32> -> vector<2x16xf32>
    %102 = arith.addf %97, %101 : vector<2x16xf32>
    %103 = vector.extract_strided_slice %28 {offsets = [30, 0], sizes = [2, 64], strides = [1, 1]} : vector<32x64xf32> to vector<2x64xf32>
    %c15 = arith.constant 15 : index
    %c0_60 = arith.constant 0 : index
    %c0_61 = arith.constant 0 : index
    %104 = vector.load %arg5[%c15, %c0_60, %c0_61] : memref<16x64x16xf32, #tpu.memory_space<vmem>>, vector<1x64x16xf32>
    %105 = vector.shape_cast %104 : vector<1x64x16xf32> to vector<64x16xf32>
    %cst_62 = arith.constant dense<0.000000e+00> : vector<2x16xf32>
    %106 = tpu.matmul %103, %105, %cst_62 {dimension_numbers = #tpu.dot_dimension_numbers<[1], [0], [0], [1], [0, 0, 1, 1], [], []>} : vector<2x64xf32>, vector<64x16xf32>, vector<2x16xf32> -> vector<2x16xf32>
    %107 = arith.addf %102, %106 : vector<2x16xf32>
    %c0_63 = arith.constant 0 : index
    %c0_64 = arith.constant 0 : index
    %108 = vector.load %arg6[%c0_63, %c0_64] : memref<1x16xf32, #tpu.memory_space<vmem>>, vector<1x16xf32>
    %109 = vector.broadcast %108 : vector<1x16xf32> to vector<2x16xf32>
    %110 = arith.addf %107, %109 : vector<2x16xf32>
    %c0_65 = arith.constant 0 : index
    %c0_66 = arith.constant 0 : index
    %111 = vector.load %arg7[%c0_65, %c0_66] : memref<2x16xf32, #tpu.memory_space<vmem>>, vector<2x16xf32>
    tpu.vector_store %arg7[%c0_65, %c0_66], %110 {strides = array<i32>} : memref<2x16xf32, #tpu.memory_space<vmem>>, vector<2x16xf32>,
    return
  }
  func.func @transform_0(%arg0: i32) -> (i32, i32) {
    %c0_i32 = arith.constant 0 : i32
    %c0_i32_0 = arith.constant 0 : i32
    %c0_i32_1 = arith.constant 0 : i32
    return %c0_i32, %c0_i32_0 : i32, i32
  }
  func.func @transform_1(%arg0: i32) -> (i32, i32) {
    %c0_i32 = arith.constant 0 : i32
    %c0_i32_0 = arith.constant 0 : i32
    %c0_i32_1 = arith.constant 0 : i32
    return %c0_i32, %c0_i32_0 : i32, i32
  }
  func.func @transform_2(%arg0: i32) -> (i32, i32) {
    %c0_i32 = arith.constant 0 : i32
    %c0_i32_0 = arith.constant 0 : i32
    %c0_i32_1 = arith.constant 0 : i32
    return %c0_i32, %c0_i32_0 : i32, i32
  }
  func.func @transform_3(%arg0: i32) -> (i32, i32) {
    %c0_i32 = arith.constant 0 : i32
    %c0_i32_0 = arith.constant 0 : i32
    %c0_i32_1 = arith.constant 0 : i32
    return %c0_i32, %c0_i32_0 : i32, i32
  }
  func.func @transform_4(%arg0: i32) -> (i32, i32, i32) {
    %c0_i32 = arith.constant 0 : i32
    %c0_i32_0 = arith.constant 0 : i32
    %c0_i32_1 = arith.constant 0 : i32
    %c0_i32_2 = arith.constant 0 : i32
    return %c0_i32, %c0_i32_0, %c0_i32_1 : i32, i32, i32
  }
  func.func @transform_5(%arg0: i32) -> (i32, i32) {
    %c0_i32 = arith.constant 0 : i32
    %c0_i32_0 = arith.constant 0 : i32
    %c0_i32_1 = arith.constant 0 : i32
    return %c0_i32, %c0_i32_0 : i32, i32
  }
  func.func @transform_6(%arg0: i32) -> (i32, i32) {
    %c0_i32 = arith.constant 0 : i32
    %c0_i32_0 = arith.constant 0 : i32
    %c0_i32_1 = arith.constant 0 : i32
    return %c0_i32, %c0_i32_0 : i32, i32
  }
}

</mosaic_0001>

<bundles_post_ra>
// kernel: encoder_forward.4
= control target key start
LH: loop header
LB: loop body
LE: loop exit
PB: predicated region body
PF: predicated region fallthrough
CT: control target
= control target key end

     0   :  { %v840_v3 = vmov 0   ;;  %vm310_vm0 = vcmask 392192   ;;  %s1080_s1 = inlined_call_operand.vmem [shape: bf16[48,2048], index: 1, kind: input, shape index: {}]   ;;  %s1081_s0 = inlined_call_operand.vmem [shape: bf16[8,48], index: 0, kind: input, shape index: {}]   ;;  %s1082_s2 = inlined_call_operand.vmem [shape: f32[8,1], index: 2, kind: input, shape index: {}]   ;;  %s1083_s3 = inlined_call_operand.vmem [shape: bf16[8,2048], index: 3, kind: output, shape index: {}]  }
   0x1   :  { %v16_v0 = vld [vmem:[%s1080_s1] sm:$0xff]  ;;  %v17_v2 = vld [vmem:[%s1080_s1 + $0x8] sm:$0xff]  ;;  %346 = vmatprep.mubr.bf16.mxu0 %v840_v3  ;;  %387 = vmatprep.mubr.bf16.mxu1 %v840_v3  ;;  %v18_v23 = vld [vmem:[%s1080_s1 + $0x10] sm:$0xff] }
   0x2   :  { %v24_v1 = vld [vmem:[%s1080_s1 + $0x40] sm:$0xff]  ;;  %v25_v5 = vld [vmem:[%s1080_s1 + $0x48] sm:$0xff]  ;;  %839 = vset.pattern.permute.xlu0 %v840_v3  ;;  %v26_v24 = vld [vmem:[%s1080_s1 + $0x50] sm:$0xff] }
   0x3   :  { %v767_v4 = vcombine.high %v16_v0, %v24_v1  ;;  %v766_v6 = vcombine.low %v16_v0, %v24_v1  ;;  %v32_v7 = vld [vmem:[%s1080_s1 + $0x80] sm:$0xff]  ;;  %v769_v9 = vcombine.high %v17_v2, %v25_v5  ;;  %v768_v10 = vcombine.low %v17_v2, %v25_v5  ;;  %v33_v12 = vld [vmem:[%s1080_s1 + $0x88] sm:$0xff]  ;;  %v19_v25 = vld [vmem:[%s1080_s1 + $0x18] sm:$0xff] }
   0x4   :  { %v40_v8 = vld [vmem:[%s1080_s1 + $0xc0] sm:$0xff]  ;;  %v41_v13 = vld [vmem:[%s1080_s1 + $0xc8] sm:$0xff]  ;;  %v27_v26 = vld [vmem:[%s1080_s1 + $0x58] sm:$0xff]  ;;  %v771_v29 = vcombine.high %v18_v23, %v26_v24  ;;  %v770_v36 = vcombine.low %v18_v23, %v26_v24 }
   0x5   :  { %v783_v11 = vcombine.high %v32_v7, %v40_v8  ;;  %v48_v14 = vld [vmem:[%s1080_s1 + $0x100] sm:$0xff]  ;;  %314 = vmatprep.subr.bf16.mxu0 %v767_v4  ;;  %v785_v15 = vcombine.high %v33_v12, %v41_v13  ;;  %v49_v17 = vld [vmem:[%s1080_s1 + $0x108] sm:$0xff]  ;;  %355 = vmatprep.subr.bf16.mxu1 %v769_v9  ;;  %v782_v19 = vcombine.low %v32_v7, %v40_v8  ;;  %v34_v31 = vld [vmem:[%s1080_s1 + $0x90] sm:$0xff] }
   0x6   :  { %v56_v16 = vld [vmem:[%s1080_s1 + $0x140] sm:$0xff]  ;;  %v57_v18 = vld [vmem:[%s1080_s1 + $0x148] sm:$0xff]  ;;  %315 = vmatpush1.bf16.msra.mxu0 %v766_v6  ;;  %356 = vmatpush1.bf16.msra.mxu1 %v768_v10  ;;  %v784_v20 = vcombine.low %v33_v12, %v41_v13  ;;  %v773_v30 = vcombine.high %v19_v25, %v27_v26  ;;  %v42_v32 = vld [vmem:[%s1080_s1 + $0xd0] sm:$0xff]  ;;  %v772_v37 = vcombine.low %v19_v25, %v27_v26 }
   0x7   :  { %316 = vmatprep.subr.bf16.mxu0 %v783_v11  ;;  %v799_v21 = vcombine.high %v48_v14, %v56_v16  ;;  %357 = vmatprep.subr.bf16.mxu1 %v785_v15  ;;  %v801_v22 = vcombine.high %v49_v17, %v57_v18  ;;  %v798_v27 = vcombine.low %v48_v14, %v56_v16  ;;  %v35_v33 = vld [vmem:[%s1080_s1 + $0x98] sm:$0xff]  ;;  %v927_v35 = vld [vmem:[%s1081_s0] sm:$0xf]  ;;  %v50_v40 = vld [vmem:[%s1080_s1 + $0x110] sm:$0xff] }
   0x8   :  { %v800_v28 = vcombine.low %v49_v17, %v57_v18  ;;  %v43_v34 = vld [vmem:[%s1080_s1 + $0xd8] sm:$0xff]  ;;  %v787_v38 = vcombine.high %v34_v31, %v42_v32  ;;  %v58_v41 = vld [vmem:[%s1080_s1 + $0x150] sm:$0xff]  ;;  %v786_v44 = vcombine.low %v34_v31, %v42_v32  ;;  %v64_v45 = vld [vmem:[%s1082_s2] sm:$0xff] }
   0x9   :  { %v789_v39 = vcombine.high %v35_v33, %v43_v34  ;;  %v51_v42 = vld [vmem:[%s1080_s1 + $0x118] sm:$0xff]  ;;  %v788_v46 = vcombine.low %v35_v33, %v43_v34  ;;  %v803_v47 = vcombine.high %v50_v40, %v58_v41  ;;  %v20_v49 = vld [vmem:[%s1080_s1 + $0x20] sm:$0xff]  ;;  %v21_v51 = vld [vmem:[%s1080_s1 + $0x28] sm:$0xff]  ;;  %67 = vperm.xlu0 %839, %v64_v45   ;;  %v802_v53 = vcombine.low %v50_v40, %v58_v41 }
   0xa   :  { %317 = vmatpush1.bf16.msra.mxu0 %v782_v19  ;;  %358 = vmatpush1.bf16.msra.mxu1 %v784_v20  ;;  %v59_v43 = vld [vmem:[%s1080_s1 + $0x158] sm:$0xff]  ;;  %v28_v50 = vld [vmem:[%s1080_s1 + $0x60] sm:$0xff]  ;;  %v29_v52 = vld [vmem:[%s1080_s1 + $0x68] sm:$0xff] }
   0xb   :  { %318 = vmatprep.subr.bf16.mxu0 %v799_v21  ;;  %359 = vmatprep.subr.bf16.mxu1 %v801_v22  ;;  %v805_v48 = vcombine.high %v51_v42, %v59_v43  ;;  %v804_v54 = vcombine.low %v51_v42, %v59_v43  ;;  %v775_v55 = vcombine.high %v20_v49, %v28_v50  ;;  %v36_v57 = vld [vmem:[%s1080_s1 + $0xa0] sm:$0xff]  ;;  %v37_v59 = vld [vmem:[%s1080_s1 + $0xa8] sm:$0xff]  ;;  %v22_v10 = vld [vmem:[%s1080_s1 + $0x30] sm:$0xff] }
   0xc   :  { %v777_v56 = vcombine.high %v21_v51, %v29_v52  ;;  %v44_v58 = vld [vmem:[%s1080_s1 + $0xe0] sm:$0xff]  ;;  %v45_v60 = vld [vmem:[%s1080_s1 + $0xe8] sm:$0xff]  ;;  %v774_v61 = vcombine.low %v20_v49, %v28_v50  ;;  %v776_v62 = vcombine.low %v21_v51, %v29_v52  ;;  %v30_v11 = vld [vmem:[%s1080_s1 + $0x70] sm:$0xff] }
   0xd   :  { %v791_v63 = vcombine.high %v36_v57, %v44_v58  ;;  %v793_v0 = vcombine.high %v37_v59, %v45_v60  ;;  %v52_v1 = vld [vmem:[%s1080_s1 + $0x120] sm:$0xff]  ;;  %v53_v4 = vld [vmem:[%s1080_s1 + $0x128] sm:$0xff]  ;;  %v790_v6 = vcombine.low %v36_v57, %v44_v58  ;;  %v792_v7 = vcombine.low %v37_v59, %v45_v60  ;;  %v23_v12 = vld [vmem:[%s1080_s1 + $0x38] sm:$0xff] }
   0xe   :  { %319 = vmatpush1.bf16.msra.mxu0 %v798_v27  ;;  %360 = vmatpush1.bf16.msra.mxu1 %v800_v28  ;;  %v60_v2 = vld [vmem:[%s1080_s1 + $0x160] sm:$0xff]  ;;  %v61_v5 = vld [vmem:[%s1080_s1 + $0x168] sm:$0xff]  ;;  %v31_v13 = vld [vmem:[%s1080_s1 + $0x78] sm:$0xff]  ;;  %v779_v16 = vcombine.high %v22_v10, %v30_v11  ;;  %v778_v22 = vcombine.low %v22_v10, %v30_v11 }
   0xf   :  { %396 = vmatprep.subr.bf16.mxu0 %v771_v29  ;;  %437 = vmatprep.subr.bf16.mxu1 %v773_v30  ;;  %v807_v8 = vcombine.high %v52_v1, %v60_v2  ;;  %v809_v9 = vcombine.high %v53_v4, %v61_v5  ;;  %v806_v14 = vcombine.low %v52_v1, %v60_v2  ;;  %v38_v18 = vld [vmem:[%s1080_s1 + $0xb0] sm:$0xff]  ;;  %v39_v20 = vld [vmem:[%s1080_s1 + $0xb8] sm:$0xff] }
  0x10   :  { %v808_v15 = vcombine.low %v53_v4, %v61_v5  ;;  %v781_v17 = vcombine.high %v23_v12, %v31_v13  ;;  %v46_v19 = vld [vmem:[%s1080_s1 + $0xf0] sm:$0xff]  ;;  %v47_v21 = vld [vmem:[%s1080_s1 + $0xf8] sm:$0xff]  ;;  %v780_v23 = vcombine.low %v23_v12, %v31_v13 }
  0x11   :  { %814 = vmatmul.mubr.msk.bf16.vlgmr.msra.gmra.mrb[0].mxu0 %vm310_vm0, %v927_v35  ;;  %815 = vmatmul.mubr.msk.bf16.vlgmr.msra.gmra.mrb[0].mxu1 %vm310_vm0, %v927_v35  ;;  %v795_v24 = vcombine.high %v38_v18, %v46_v19  ;;  %v797_v25 = vcombine.high %v39_v20, %v47_v21  ;;  %v54_v26 = vld [vmem:[%s1080_s1 + $0x130] sm:$0xff]  ;;  %v55_v28 = vld [vmem:[%s1080_s1 + $0x138] sm:$0xff]  ;;  %v794_v30 = vcombine.low %v38_v18, %v46_v19 }
  0x12   :  { %397 = vmatpush1.bf16.msra.mxu0 %v770_v36  ;;  %438 = vmatpush1.bf16.msra.mxu1 %v772_v37  ;;  %v62_v27 = vld [vmem:[%s1080_s1 + $0x170] sm:$0xff]  ;;  %v63_v29 = vld [vmem:[%s1080_s1 + $0x178] sm:$0xff]  ;;  %v796_v31 = vcombine.low %v39_v20, %v47_v21 }
  0x13   :  { %398 = vmatprep.subr.bf16.mxu0 %v787_v38  ;;  %439 = vmatprep.subr.bf16.mxu1 %v789_v39  ;;  %v811_v32 = vcombine.high %v54_v26, %v62_v27  ;;  %v813_v33 = vcombine.high %v55_v28, %v63_v29  ;;  %v810_v34 = vcombine.low %v54_v26, %v62_v27 }
  0x14   :  { %428 = vmatprep.mubr.bf16.mxu0 %v840_v3  ;;  %469 = vmatprep.mubr.bf16.mxu1 %v840_v3  ;;  %v812_v36 = vcombine.low %v55_v28, %v63_v29 }
  0x16   :  { %399 = vmatpush1.bf16.msra.mxu0 %v786_v44  ;;  %440 = vmatpush1.bf16.msra.mxu1 %v788_v46 }
  0x17   :  { %400 = vmatprep.subr.bf16.mxu0 %v803_v47  ;;  %441 = vmatprep.subr.bf16.mxu1 %v805_v48 }
  0x1a   :  { %401 = vmatpush1.bf16.msra.mxu0 %v802_v53  ;;  %442 = vmatpush1.bf16.msra.mxu1 %v804_v54 }
  0x1b   :  { %478 = vmatprep.subr.bf16.mxu0 %v775_v55  ;;  %519 = vmatprep.subr.bf16.mxu1 %v777_v56 }
  0x1d   :  { %816 = vmatmul.mubr.msk.bf16.vlgmr.msra.gmra.mrb[4].mxu0 %vm310_vm0, %v927_v35  ;;  %817 = vmatmul.mubr.msk.bf16.vlgmr.msra.gmra.mrb[4].mxu1 %vm310_vm0, %v927_v35 }
  0x1e   :  { %479 = vmatpush1.bf16.msra.mxu0 %v774_v61  ;;  %520 = vmatpush1.bf16.msra.mxu1 %v776_v62 }
  0x1f   :  { %480 = vmatprep.subr.bf16.mxu0 %v791_v63  ;;  %521 = vmatprep.subr.bf16.mxu1 %v793_v0 }
  0x20   :  { %510 = vmatprep.mubr.bf16.mxu0 %v840_v3  ;;  %551 = vmatprep.mubr.bf16.mxu1 %v840_v3 }
  0x22   :  { %481 = vmatpush1.bf16.msra.mxu0 %v790_v6  ;;  %522 = vmatpush1.bf16.msra.mxu1 %v792_v7 }
  0x23   :  { %482 = vmatprep.subr.bf16.mxu0 %v807_v8  ;;  %523 = vmatprep.subr.bf16.mxu1 %v809_v9 }
  0x26   :  { %483 = vmatpush1.bf16.msra.mxu0 %v806_v14  ;;  %524 = vmatpush1.bf16.msra.mxu1 %v808_v15 }
  0x27   :  { %560 = vmatprep.subr.bf16.mxu0 %v779_v16  ;;  %601 = vmatprep.subr.bf16.mxu1 %v781_v17 }
  0x29   :  { %818 = vmatmul.mubr.msk.bf16.vlgmr.msra.gmra.mrb[8].mxu0 %vm310_vm0, %v927_v35  ;;  %819 = vmatmul.mubr.msk.bf16.vlgmr.msra.gmra.mrb[8].mxu1 %vm310_vm0, %v927_v35 }
  0x2a   :  { %561 = vmatpush1.bf16.msra.mxu0 %v778_v22  ;;  %602 = vmatpush1.bf16.msra.mxu1 %v780_v23 }
  0x2b   :  { %562 = vmatprep.subr.bf16.mxu0 %v795_v24  ;;  %603 = vmatprep.subr.bf16.mxu1 %v797_v25 }
  0x2c   :  { %592 = vmatprep.mubr.bf16.mxu0 %v840_v3  ;;  %633 = vmatprep.mubr.bf16.mxu1 %v840_v3 }
  0x2e   :  { %563 = vmatpush1.bf16.msra.mxu0 %v794_v30  ;;  %604 = vmatpush1.bf16.msra.mxu1 %v796_v31 }
  0x2f   :  { %564 = vmatprep.subr.bf16.mxu0 %v811_v32  ;;  %605 = vmatprep.subr.bf16.mxu1 %v813_v33 }
  0x32   :  { %565 = vmatpush1.bf16.msra.mxu0 %v810_v34  ;;  %606 = vmatpush1.bf16.msra.mxu1 %v812_v36 }
  0x35   :  { %820 = vmatmul.mubr.msk.bf16.vlgmr.msra.gmra.mrb[12].mxu0 %vm310_vm0, %v927_v35  ;;  %821 = vmatmul.mubr.msk.bf16.vlgmr.msra.gmra.mrb[12].mxu1 %vm310_vm0, %v927_v35 }
  0x88   :  { %v1038_v37 = vpop.permute.xlu0 %67 }
  0xe4   :  { %v348_v38 = vpop.f32.mrb[0].mxu0  ;;  %v389_v3 = vpop.f32.mrb[0].mxu1 }
  0xe5   :  { %v349_v39 = vadd.f32 %v348_v38, %v1038_v37  ;;  %v350_v40 = vpop.f32.mrb[1].mxu0  ;;  %v390_v41 = vadd.f32 %v389_v3, %v1038_v37  ;;  %v391_v43 = vpop.f32.mrb[1].mxu1 }
  0xe6   :  { %v351_v42 = vadd.f32 %v350_v40, %v1038_v37  ;;  %v352_v44 = vpop.f32.mrb[2].mxu0  ;;  %v392_v46 = vadd.f32 %v391_v43, %v1038_v37  ;;  %v393_v47 = vpop.f32.mrb[2].mxu1 }
  0xe7   :  { %vm642_vm1 = vcmp.ge.f32.partialorder %v349_v39, 0.0  ;;  %v658_v45 = vmul.f32 0.2, %v349_v39  ;;  %v353_v48 = vpop.f32.mrb[3].mxu0  ;;  %vm644_vm2 = vcmp.ge.f32.partialorder %v390_v41, 0.0  ;;  %v394_v52 = vpop.f32.mrb[3].mxu1 }
  0xe8   :  { %v660_v35 = vmul.f32 0.2, %v390_v41  ;;  %vm643_vm3 = vcmp.ge.f32.partialorder %v351_v42, 0.0  ;;  %v659_v49 = vmul.f32 0.2, %v351_v42  ;;  %vm645_vm4 = vcmp.ge.f32.partialorder %v392_v46, 0.0 }
  0xe9   :  { %v674_v50 = vsel %vm642_vm1, %v349_v39, %v658_v45  ;;  %v661_v51 = vmul.f32 0.2, %v392_v46 }
  0xea   :  { %v676_v53 = vsel %vm644_vm2, %v390_v41, %v660_v35  ;;  %v675_v54 = vsel %vm643_vm3, %v351_v42, %v659_v49 }
  0xeb   :  { %v830_v55 = vpack.c.bf16 %v675_v54, %v674_v50  ;;  %v677_v56 = vsel %vm645_vm4, %v392_v46, %v661_v51 }
  0xec   :  { %v831_v57 = vpack.c.bf16 %v677_v56, %v676_v53 }
  0xed   :  { %754 = vst [vmem:[%s1083_s3] sm:$0xff] %v830_v55 }
  0xee   :  { %755 = vst [vmem:[%s1083_s3 + $0x8] sm:$0xff] %v831_v57 }
  0xf0   :  { %v430_v58 = vpop.f32.mrb[4].mxu0  ;;  %v471_v60 = vpop.f32.mrb[4].mxu1 }
  0xf1   :  { %v431_v59 = vadd.f32 %v430_v58, %v1038_v37  ;;  %v432_v61 = vpop.f32.mrb[5].mxu0  ;;  %v472_v62 = vadd.f32 %v471_v60, %v1038_v37  ;;  %v473_v0 = vpop.f32.mrb[5].mxu1 }
  0xf2   :  { %v433_v63 = vadd.f32 %v432_v61, %v1038_v37  ;;  %v434_v1 = vpop.f32.mrb[6].mxu0  ;;  %v474_v4 = vadd.f32 %v473_v0, %v1038_v37  ;;  %v475_v5 = vpop.f32.mrb[6].mxu1 }
  0xf3   :  { %vm646_vm5 = vcmp.ge.f32.partialorder %v431_v59, 0.0  ;;  %v662_v2 = vmul.f32 0.2, %v431_v59  ;;  %v435_v6 = vpop.f32.mrb[7].mxu0  ;;  %vm648_vm6 = vcmp.ge.f32.partialorder %v472_v62, 0.0  ;;  %v476_v11 = vpop.f32.mrb[7].mxu1 }
  0xf4   :  { %v664_v7 = vmul.f32 0.2, %v472_v62  ;;  %vm647_vm7 = vcmp.ge.f32.partialorder %v433_v63, 0.0  ;;  %v663_v8 = vmul.f32 0.2, %v433_v63  ;;  %vm649_vm8 = vcmp.ge.f32.partialorder %v474_v4, 0.0 }
  0xf5   :  { %v678_v9 = vsel %vm646_vm5, %v431_v59, %v662_v2  ;;  %v665_v10 = vmul.f32 0.2, %v474_v4 }
  0xf6   :  { %v680_v12 = vsel %vm648_vm6, %v472_v62, %v664_v7  ;;  %v679_v13 = vsel %vm647_vm7, %v433_v63, %v663_v8 }
  0xf7   :  { %v832_v14 = vpack.c.bf16 %v679_v13, %v678_v9  ;;  %v681_v15 = vsel %vm649_vm8, %v474_v4, %v665_v10 }
  0xf8   :  { %v833_v16 = vpack.c.bf16 %v681_v15, %v680_v12 }
  0xf9   :  { %756 = vst [vmem:[%s1083_s3 + $0x10] sm:$0xff] %v832_v14 }
  0xfa   :  { %757 = vst [vmem:[%s1083_s3 + $0x18] sm:$0xff] %v833_v16 }
  0xfc   :  { %v512_v17 = vpop.f32.mrb[8].mxu0  ;;  %v553_v19 = vpop.f32.mrb[8].mxu1 }
  0xfd   :  { %v513_v18 = vadd.f32 %v512_v17, %v1038_v37  ;;  %v514_v20 = vpop.f32.mrb[9].mxu0  ;;  %v554_v21 = vadd.f32 %v553_v19, %v1038_v37  ;;  %v555_v23 = vpop.f32.mrb[9].mxu1 }
  0xfe   :  { %v515_v22 = vadd.f32 %v514_v20, %v1038_v37  ;;  %v516_v24 = vpop.f32.mrb[10].mxu0  ;;  %v556_v26 = vadd.f32 %v555_v23, %v1038_v37  ;;  %v557_v27 = vpop.f32.mrb[10].mxu1 }
  0xff   :  { %vm650_vm9 = vcmp.ge.f32.partialorder %v513_v18, 0.0  ;;  %v666_v25 = vmul.f32 0.2, %v513_v18  ;;  %v517_v28 = vpop.f32.mrb[11].mxu0  ;;  %vm652_vm10 = vcmp.ge.f32.partialorder %v554_v21, 0.0  ;;  %v558_v33 = vpop.f32.mrb[11].mxu1 }
 0x100   :  { %v668_v29 = vmul.f32 0.2, %v554_v21  ;;  %vm651_vm11 = vcmp.ge.f32.partialorder %v515_v22, 0.0  ;;  %v667_v30 = vmul.f32 0.2, %v515_v22  ;;  %vm653_vm12 = vcmp.ge.f32.partialorder %v556_v26, 0.0 }
 0x101   :  { %v682_v31 = vsel %vm650_vm9, %v513_v18, %v666_v25  ;;  %v669_v32 = vmul.f32 0.2, %v556_v26 }
 0x102   :  { %v684_v34 = vsel %vm652_vm10, %v554_v21, %v668_v29  ;;  %v683_v36 = vsel %vm651_vm11, %v515_v22, %v667_v30 }
 0x103   :  { %v834_v38 = vpack.c.bf16 %v683_v36, %v682_v31  ;;  %v685_v39 = vsel %vm653_vm12, %v556_v26, %v669_v32 }
 0x104   :  { %v835_v3 = vpack.c.bf16 %v685_v39, %v684_v34 }
 0x105   :  { %758 = vst [vmem:[%s1083_s3 + $0x20] sm:$0xff] %v834_v38 }
 0x106   :  { %759 = vst [vmem:[%s1083_s3 + $0x28] sm:$0xff] %v835_v3 }
 0x108   :  { %v594_v40 = vpop.f32.mrb[12].mxu0  ;;  %v635_v42 = vpop.f32.mrb[12].mxu1 }
 0x109   :  { %v595_v41 = vadd.f32 %v594_v40, %v1038_v37  ;;  %v596_v43 = vpop.f32.mrb[13].mxu0  ;;  %v636_v44 = vadd.f32 %v635_v42, %v1038_v37  ;;  %v637_v46 = vpop.f32.mrb[13].mxu1 }
 0x10a   :  { %v597_v45 = vadd.f32 %v596_v43, %v1038_v37  ;;  %v598_v47 = vpop.f32.mrb[14].mxu0  ;;  %v638_v35 = vadd.f32 %v637_v46, %v1038_v37  ;;  %v639_v49 = vpop.f32.mrb[14].mxu1 }
 0x10b   :  { %vm654_vm13 = vcmp.ge.f32.partialorder %v595_v41, 0.0  ;;  %v670_v48 = vmul.f32 0.2, %v595_v41  ;;  %v599_v50 = vpop.f32.mrb[15].mxu0  ;;  %vm656_vm14 = vcmp.ge.f32.partialorder %v636_v44, 0.0  ;;  %v640_v55 = vpop.f32.mrb[15].mxu1 }
 0x10c   :  { %v672_v51 = vmul.f32 0.2, %v636_v44  ;;  %vm655_vm15 = vcmp.ge.f32.partialorder %v597_v45, 0.0  ;;  %v671_v52 = vmul.f32 0.2, %v597_v45  ;;  %vm657_vm0 = vcmp.ge.f32.partialorder %v638_v35, 0.0 }
 0x10d   :  { %v686_v53 = vsel %vm654_vm13, %v595_v41, %v670_v48  ;;  %v673_v54 = vmul.f32 0.2, %v638_v35 }
 0x10e   :  { %v688_v56 = vsel %vm656_vm14, %v636_v44, %v672_v51  ;;  %v687_v57 = vsel %vm655_vm15, %v597_v45, %v671_v52 }
 0x10f   :  { %v836_v58 = vpack.c.bf16 %v687_v57, %v686_v53  ;;  %v689_v59 = vsel %vm657_vm0, %v638_v35, %v673_v54 }
 0x110   :  { %v837_v60 = vpack.c.bf16 %v689_v59, %v688_v56 }
 0x111   :  { %760 = vst [vmem:[%s1083_s3 + $0x30] sm:$0xff] %v836_v58 }
 0x112   :  { %761 = vst [vmem:[%s1083_s3 + $0x38] sm:$0xff] %v837_v60 }

// kernel: encoder_forward.5
= control target key start
LH: loop header
LB: loop body
LE: loop exit
PB: predicated region body
PF: predicated region fallthrough
CT: control target
= control target key end

     0   :  { %v543_v1 = vmov 0   ;;  %s692_s1 = inlined_call_operand.vmem [shape: bf16[128,512], index: 1, kind: input, shape index: {}]   ;;  %s693_s0 = inlined_call_operand.vmem [shape: bf16[16,128], index: 0, kind: input, shape index: {}]   ;;  %s694_s3 = inlined_call_operand.vmem [shape: f32[16,1], index: 3, kind: input, shape index: {}]   ;;  %s695_s2 = inlined_call_operand.vmem [shape: f32[16,1], index: 2, kind: input, shape index: {}]   ;;  %s696_s4 = inlined_call_operand.vmem [shape: bf16[16,512], index: 4, kind: output, shape index: {}]  }
   0x1   :  { %v490_v0 = vld [vmem:[%s692_s1 + $0x4] ss:$16 sps:$4 sm:$0xff]   ;;  %250 = vmatprep.mubr.bf16.mxu0 %v543_v1  ;;  %293 = vmatprep.mubr.bf16.mxu1 %v543_v1  ;;  %v492_v2 = vld [vmem:[%s692_s1 + $0xc] ss:$16 sps:$4 sm:$0xff]   ;;  %v494_v3 = vld [vmem:[%s692_s1] ss:$16 sps:$4 sm:$0xff]  }
   0x2   :  { %489 = vset.pattern.permute.xlu1 %v543_v1  ;;  %488 = vset.pattern.permute.xlu0 %v543_v1  ;;  %v495_v4 = vld [vmem:[%s692_s1 + $0x8] ss:$16 sps:$4 sm:$0xff]   ;;  %v496_v5 = vld [vmem:[%s692_s1 + $0x24] ss:$16 sps:$4 sm:$0xff]   ;;  %v498_v6 = vld [vmem:[%s692_s1 + $0x2c] ss:$16 sps:$4 sm:$0xff]  }
   0x3   :  { %218 = vmatprep.subr.bf16.mxu0 %v490_v0  ;;  %261 = vmatprep.subr.bf16.mxu1 %v492_v2  ;;  %v500_v7 = vld [vmem:[%s692_s1 + $0x20] ss:$16 sps:$4 sm:$0xff]   ;;  %v501_v8 = vld [vmem:[%s692_s1 + $0x28] ss:$16 sps:$4 sm:$0xff]   ;;  %v502_v9 = vld [vmem:[%s692_s1 + $0x44] ss:$16 sps:$4 sm:$0xff]  }
   0x4   :  { %219 = vmatpush1.bf16.msra.mxu0 %v494_v3  ;;  %262 = vmatpush1.bf16.msra.mxu1 %v495_v4  ;;  %v504_v10 = vld [vmem:[%s692_s1 + $0x4c] ss:$16 sps:$4 sm:$0xff]   ;;  %v506_v11 = vld [vmem:[%s692_s1 + $0x40] ss:$16 sps:$4 sm:$0xff]   ;;  %v507_v12 = vld [vmem:[%s692_s1 + $0x48] ss:$16 sps:$4 sm:$0xff]  }
   0x5   :  { %220 = vmatprep.subr.bf16.mxu0 %v496_v5  ;;  %263 = vmatprep.subr.bf16.mxu1 %v498_v6  ;;  %v508_v13 = vld [vmem:[%s692_s1 + $0x64] ss:$16 sps:$4 sm:$0xff]   ;;  %v510_v14 = vld [vmem:[%s692_s1 + $0x6c] ss:$16 sps:$4 sm:$0xff]   ;;  %v512_v15 = vld [vmem:[%s692_s1 + $0x60] ss:$16 sps:$4 sm:$0xff]  }
   0x6   :  { %v513_v16 = vld [vmem:[%s692_s1 + $0x68] ss:$16 sps:$4 sm:$0xff]   ;;  %v514_v17 = vld [vmem:[%s692_s1 + $0x84] ss:$16 sps:$4 sm:$0xff]   ;;  %v516_v18 = vld [vmem:[%s692_s1 + $0x8c] ss:$16 sps:$4 sm:$0xff]  }
   0x7   :  { %v518_v19 = vld [vmem:[%s692_s1 + $0x80] ss:$16 sps:$4 sm:$0xff]   ;;  %v519_v20 = vld [vmem:[%s692_s1 + $0x88] ss:$16 sps:$4 sm:$0xff]   ;;  %v520_v21 = vld [vmem:[%s692_s1 + $0xa4] ss:$16 sps:$4 sm:$0xff]  }
   0x8   :  { %221 = vmatpush1.bf16.msra.mxu0 %v500_v7  ;;  %264 = vmatpush1.bf16.msra.mxu1 %v501_v8  ;;  %v522_v22 = vld [vmem:[%s692_s1 + $0xac] ss:$16 sps:$4 sm:$0xff]   ;;  %v524_v23 = vld [vmem:[%s692_s1 + $0xa0] ss:$16 sps:$4 sm:$0xff]   ;;  %v525_v24 = vld [vmem:[%s692_s1 + $0xa8] ss:$16 sps:$4 sm:$0xff]  }
   0x9   :  { %222 = vmatprep.subr.bf16.mxu0 %v502_v9  ;;  %265 = vmatprep.subr.bf16.mxu1 %v504_v10  ;;  %v526_v25 = vld [vmem:[%s692_s1 + $0xc4] ss:$16 sps:$4 sm:$0xff]   ;;  %v528_v26 = vld [vmem:[%s692_s1 + $0xcc] ss:$16 sps:$4 sm:$0xff]   ;;  %v530_v27 = vld [vmem:[%s692_s1 + $0xc0] ss:$16 sps:$4 sm:$0xff]  }
   0xa   :  { %v531_v28 = vld [vmem:[%s692_s1 + $0xc8] ss:$16 sps:$4 sm:$0xff]   ;;  %v532_v29 = vld [vmem:[%s692_s1 + $0xe4] ss:$16 sps:$4 sm:$0xff]   ;;  %v534_v30 = vld [vmem:[%s692_s1 + $0xec] ss:$16 sps:$4 sm:$0xff]  }
   0xb   :  { %v536_v31 = vld [vmem:[%s692_s1 + $0xe0] ss:$16 sps:$4 sm:$0xff]   ;;  %v537_v32 = vld [vmem:[%s692_s1 + $0xe8] ss:$16 sps:$4 sm:$0xff]  }
   0xc   :  { %223 = vmatpush1.bf16.msra.mxu0 %v506_v11  ;;  %266 = vmatpush1.bf16.msra.mxu1 %v507_v12  ;;  %v538_v33 = vld [vmem:[%s693_s0] sm:$0xff]  }
   0xd   :  { %224 = vmatprep.subr.bf16.mxu0 %v508_v13  ;;  %267 = vmatprep.subr.bf16.mxu1 %v510_v14  ;;  %v370_v10 = vld [vmem:[%s694_s3] sm:$0xff] }
  0x10   :  { %225 = vmatpush1.bf16.msra.mxu0 %v512_v15  ;;  %268 = vmatpush1.bf16.msra.mxu1 %v513_v16 }
  0x11   :  { %226 = vmatprep.subr.bf16.mxu0 %v514_v17  ;;  %269 = vmatprep.subr.bf16.mxu1 %v516_v18  ;;  %v344_v17 = vld [vmem:[%s695_s2] sm:$0xff] }
  0x14   :  { %227 = vmatpush1.bf16.msra.mxu0 %v518_v19  ;;  %270 = vmatpush1.bf16.msra.mxu1 %v519_v20  ;;  %v345_v20 = vld [vmem:[%s695_s2 + $0x8] sm:$0xff] }
  0x15   :  { %228 = vmatprep.subr.bf16.mxu0 %v520_v21  ;;  %271 = vmatprep.subr.bf16.mxu1 %v522_v22 }
  0x18   :  { %229 = vmatpush1.bf16.msra.mxu0 %v524_v23  ;;  %272 = vmatpush1.bf16.msra.mxu1 %v525_v24  ;;  %v371_v23 = vld [vmem:[%s694_s3 + $0x8] sm:$0xff] }
  0x19   :  { %230 = vmatprep.subr.bf16.mxu0 %v526_v25  ;;  %273 = vmatprep.subr.bf16.mxu1 %v528_v26 }
  0x1c   :  { %231 = vmatpush1.bf16.msra.mxu0 %v530_v27  ;;  %274 = vmatpush1.bf16.msra.mxu1 %v531_v28 }
  0x1d   :  { %232 = vmatprep.subr.bf16.mxu0 %v532_v29  ;;  %275 = vmatprep.subr.bf16.mxu1 %v534_v30 }
  0x20   :  { %233 = vmatpush1.bf16.msra.mxu0 %v536_v31  ;;  %276 = vmatpush1.bf16.msra.mxu1 %v537_v32 }
  0x23   :  { %251 = vmatmul.mubr.bf16.vlgmr.msra.gmra.mrb[0].mxu0 %v538_v33  ;;  %294 = vmatmul.mubr.bf16.vlgmr.msra.gmra.mrb[0].mxu1 %v538_v33 }
  0xf6   :  { %v252_v34 = vpop.f32.mrb[0].mxu0  ;;  %v295_v35 = vpop.f32.mrb[0].mxu1 }
  0xf7   :  { %v254_v36 = vpop.f32.mrb[1].mxu0  ;;  %v297_v37 = vpop.f32.mrb[1].mxu1 }
  0xf8   :  { %v304_v38 = vadd.f32 %v254_v36, %v252_v34  ;;  %v256_v39 = vpop.f32.mrb[2].mxu0  ;;  %v299_v40 = vpop.f32.mrb[2].mxu1 }
  0xf9   :  { %v258_v41 = vpop.f32.mrb[3].mxu0  ;;  %v301_v42 = vpop.f32.mrb[3].mxu1 }
  0xfa   :  { %v309_v43 = vadd.f32 %v258_v41, %v256_v39  ;;  %v305_v44 = vadd.f32 %v304_v38, %v295_v35 }
  0xfc   :  { %v310_v45 = vadd.f32 %v309_v43, %v299_v40  ;;  %v306_v46 = vadd.f32 %v305_v44, %v297_v37 }
  0xfe   :  { %v311_v47 = vadd.f32 %v310_v45, %v301_v42  ;;  %307 = vadd.xlane.f32.xlu0 %v306_v46 }
 0x102   :  { %312 = vadd.xlane.f32.xlu0 %v311_v47 }
 0x18b   :  { %v308_v48 = vpop.xlane.xlu0 %307 }
 0x18c   :  { %v314_v49 = vmul.f32 0.001953125, %v308_v48 }
 0x18e   :  { %v316_v50 = vsub.f32 %v252_v34, %v314_v49  ;;  %v317_v51 = vsub.f32 %v254_v36, %v314_v49  ;;  %v318_v52 = vsub.f32 %v295_v35, %v314_v49  ;;  %v319_v54 = vsub.f32 %v297_v37, %v314_v49 }
 0x18f   :  { %v313_v53 = vpop.xlane.xlu0 %312 }
 0x190   :  { %v315_v55 = vmul.f32 0.001953125, %v313_v53  ;;  %v324_v56 = vmul.f32 %v316_v50, %v316_v50  ;;  %v325_v57 = vmul.f32 %v317_v51, %v317_v51  ;;  %v326_v58 = vmul.f32 %v318_v52, %v318_v52 }
 0x191   :  { %v327_v63 = vmul.f32 %v319_v54, %v319_v54 }
 0x192   :  { %v320_v59 = vsub.f32 %v256_v39, %v315_v55  ;;  %v321_v60 = vsub.f32 %v258_v41, %v315_v55  ;;  %v332_v61 = vadd.f32 %v325_v57, %v324_v56  ;;  %v322_v62 = vsub.f32 %v299_v40, %v315_v55 }
 0x193   :  { %v323_v1 = vsub.f32 %v301_v42, %v315_v55 }
 0x194   :  { %v333_v0 = vadd.f32 %v332_v61, %v326_v58  ;;  %v328_v2 = vmul.f32 %v320_v59, %v320_v59  ;;  %v329_v3 = vmul.f32 %v321_v60, %v321_v60  ;;  %v330_v5 = vmul.f32 %v322_v62, %v322_v62 }
 0x195   :  { %v331_v7 = vmul.f32 %v323_v1, %v323_v1 }
 0x196   :  { %v334_v4 = vadd.f32 %v333_v0, %v327_v63  ;;  %v337_v6 = vadd.f32 %v329_v3, %v328_v2 }
 0x198   :  { %335 = vadd.xlane.f32.xlu1 %v334_v4  ;;  %v338_v8 = vadd.f32 %v337_v6, %v330_v5 }
 0x19a   :  { %v339_v9 = vadd.f32 %v338_v8, %v331_v7 }
 0x19c   :  { %340 = vadd.xlane.f32.xlu1 %v339_v9 }
 0x1ad   :  { %374 = vperm.xlu1 %489, %v370_v10  }
 0x225   :  { %v336_v11 = vpop.xlane.xlu1 %335 }
 0x226   :  { %v342_v12 = vmul.f32 0.001953125, %v336_v11 }
 0x228   :  { %v346_v13 = vadd.f32 1e-05, %v342_v12 }
 0x229   :  { %v341_v14 = vpop.xlane.xlu1 %340 }
 0x22a   :  { %539 = vrsqrt.f32 %v346_v13  ;;  %v343_v15 = vmul.f32 0.001953125, %v341_v14 }
 0x22c   :  { %v347_v16 = vadd.f32 1e-05, %v343_v15 }
 0x22d   :  { %v375_v24 = vpop.permute.xlu1 %374 }
 0x22e   :  { %541 = vrsqrt.f32 %v347_v16 }
 0x234   :  { %v540_v18 = vpop.eup %539 }
 0x235   :  { %v350_v19 = vmul.f32 %v540_v18, %v344_v17 }
 0x237   :  { %354 = vperm.xlu0 %488, %v350_v19  }
 0x238   :  { %v542_v21 = vpop.eup %541 }
 0x239   :  { %v351_v22 = vmul.f32 %v542_v21, %v345_v20 }
 0x23b   :  { %359 = vperm.xlu1 %489, %v351_v22  }
 0x23f   :  { %379 = vperm.xlu1 %489, %v371_v23  }
 0x2b6   :  { %v355_v25 = vpop.permute.xlu0 %354 }
 0x2b7   :  { %v362_v26 = vmul.f32 %v355_v25, %v316_v50  ;;  %v363_v27 = vmul.f32 %v355_v25, %v317_v51  ;;  %v364_v28 = vmul.f32 %v355_v25, %v318_v52  ;;  %v365_v29 = vmul.f32 %v355_v25, %v319_v54 }
 0x2b9   :  { %v382_v30 = vadd.f32 %v375_v24, %v362_v26  ;;  %v383_v31 = vadd.f32 %v375_v24, %v363_v27  ;;  %v384_v32 = vadd.f32 %v375_v24, %v364_v28  ;;  %v385_v33 = vadd.f32 %v375_v24, %v365_v29 }
 0x2ba   :  { %v360_v34 = vpop.permute.xlu1 %359 }
 0x2bb   :  { %vm390_vm0 = vcmp.ge.f32.partialorder %v382_v30, 0.0  ;;  %vm391_vm1 = vcmp.ge.f32.partialorder %v383_v31, 0.0  ;;  %vm392_vm2 = vcmp.ge.f32.partialorder %v384_v32, 0.0  ;;  %vm393_vm3 = vcmp.ge.f32.partialorder %v385_v33, 0.0 }
 0x2bc   :  { %v398_v35 = vmul.f32 0.2, %v382_v30  ;;  %v399_v36 = vmul.f32 0.2, %v383_v31  ;;  %v400_v37 = vmul.f32 0.2, %v384_v32  ;;  %v366_v39 = vmul.f32 %v360_v34, %v320_v59 }
 0x2bd   :  { %v401_v38 = vmul.f32 0.2, %v385_v33  ;;  %v367_v40 = vmul.f32 %v360_v34, %v321_v60  ;;  %v368_v41 = vmul.f32 %v360_v34, %v322_v62  ;;  %v369_v45 = vmul.f32 %v360_v34, %v323_v1 }
 0x2be   :  { %v406_v42 = vsel %vm390_vm0, %v382_v30, %v398_v35  ;;  %v407_v43 = vsel %vm391_vm1, %v383_v31, %v399_v36  ;;  %v408_v44 = vsel %vm392_vm2, %v384_v32, %v400_v37  ;;  %v380_v46 = vpop.permute.xlu1 %379 }
 0x2bf   :  { %v409_v47 = vsel %vm393_vm3, %v385_v33, %v401_v38  ;;  %v483_v48 = vpack.c.bf16 %v407_v43, %v406_v42  ;;  %v386_v49 = vadd.f32 %v380_v46, %v366_v39  ;;  %v387_v50 = vadd.f32 %v380_v46, %v367_v40 }
 0x2c0   :  { %v484_v51 = vpack.c.bf16 %v409_v47, %v408_v44  ;;  %v388_v52 = vadd.f32 %v380_v46, %v368_v41  ;;  %v389_v53 = vadd.f32 %v380_v46, %v369_v45 }
 0x2c1   :  { %438 = vst [vmem:[%s696_s4] sm:$0xff] %v483_v48  ;;  %vm394_vm4 = vcmp.ge.f32.partialorder %v386_v49, 0.0  ;;  %vm395_vm5 = vcmp.ge.f32.partialorder %v387_v50, 0.0  ;;  %v402_v54 = vmul.f32 0.2, %v386_v49  ;;  %v403_v55 = vmul.f32 0.2, %v387_v50 }
 0x2c2   :  { %439 = vst [vmem:[%s696_s4 + $0x8] sm:$0xff] %v484_v51  ;;  %vm396_vm6 = vcmp.ge.f32.partialorder %v388_v52, 0.0  ;;  %vm397_vm7 = vcmp.ge.f32.partialorder %v389_v53, 0.0  ;;  %v404_v56 = vmul.f32 0.2, %v388_v52 }
 0x2c3   :  { %v405_v57 = vmul.f32 0.2, %v389_v53  ;;  %v410_v58 = vsel %vm394_vm4, %v386_v49, %v402_v54  ;;  %v411_v59 = vsel %vm395_vm5, %v387_v50, %v403_v55 }
 0x2c4   :  { %v412_v60 = vsel %vm396_vm6, %v388_v52, %v404_v56  ;;  %v485_v62 = vpack.c.bf16 %v411_v59, %v410_v58 }
 0x2c5   :  { %v413_v61 = vsel %vm397_vm7, %v389_v53, %v405_v57 }
 0x2c6   :  { %v486_v63 = vpack.c.bf16 %v413_v61, %v412_v60  ;;  %440 = vst [vmem:[%s696_s4 + $0x10] sm:$0xff] %v485_v62 }
 0x2c8   :  { %441 = vst [vmem:[%s696_s4 + $0x18] sm:$0xff] %v486_v63 }

// kernel: encoder_forward.6
= control target key start
LH: loop header
LB: loop body
LE: loop exit
PB: predicated region body
PF: predicated region fallthrough
CT: control target
= control target key end

     0   :  { %v471_v48 = vmov 0   ;;  %s607_s1 = inlined_call_operand.vmem [shape: bf16[256,128], index: 1, kind: input, shape index: {}]   ;;  %s608_s0 = inlined_call_operand.vmem [shape: bf16[32,256], index: 0, kind: input, shape index: {}]   ;;  %s609_s3 = inlined_call_operand.vmem [shape: f32[32,1], index: 3, kind: input, shape index: {}]   ;;  %s610_s2 = inlined_call_operand.vmem [shape: f32[32,1], index: 2, kind: input, shape index: {}]   ;;  %s611_s4 = inlined_call_operand.vmem [shape: bf16[32,128], index: 4, kind: output, shape index: {}]  }
   0x1   :  { %v441_v0 = vld [vmem:[%s607_s1 + $0x40] sm:$0xff]   ;;  %v443_v2 = vld [vmem:[%s607_s1 + $0x48] sm:$0xff]   ;;  %v445_v4 = vld [vmem:[%s607_s1 + $0x50] sm:$0xff]   ;;  %440 = vset.pattern.permute.xlu1 %v471_v48  ;;  %439 = vset.pattern.permute.xlu0 %v471_v48 }
   0x2   :  { %v442_v1 = vld [vmem:[%s607_s1] sm:$0xff]   ;;  %394 = vmatprep.subr.bf16.mxu0 %v441_v0  ;;  %422 = vmatprep.subr.bf16.mxu1 %v441_v0  ;;  %v444_v3 = vld [vmem:[%s607_s1 + $0x8] sm:$0xff]   ;;  %v446_v5 = vld [vmem:[%s607_s1 + $0x10] sm:$0xff]  }
   0x3   :  { %395 = vmatpush3.bf16.msra.mxu0 %v442_v1  ;;  %430 = vmatpush3.bf16.msra.mxu1 %v442_v1  ;;  %v447_v6 = vld [vmem:[%s607_s1 + $0x58] sm:$0xff]   ;;  %v449_v8 = vld [vmem:[%s607_s1 + $0x60] sm:$0xff]   ;;  %v451_v10 = vld [vmem:[%s607_s1 + $0x68] sm:$0xff]  }
   0x4   :  { %396 = vmatprep.subr.bf16.mxu0 %v443_v2  ;;  %423 = vmatprep.subr.bf16.mxu1 %v443_v2  ;;  %v448_v7 = vld [vmem:[%s607_s1 + $0x18] sm:$0xff]   ;;  %v450_v9 = vld [vmem:[%s607_s1 + $0x20] sm:$0xff]   ;;  %v452_v13 = vld [vmem:[%s607_s1 + $0x28] sm:$0xff]  }
   0x5   :  { %v459_v11 = vld [vmem:[%s608_s0 + $0x4] ss:$8 sps:$4 sm:$0xff]   ;;  %v462_v12 = vld [vmem:[%s608_s0 + $0x14] ss:$8 sps:$4 sm:$0xff]   ;;  %v457_v18 = vld [vmem:[%s608_s0] ss:$8 sps:$4 sm:$0xff]  }
   0x6   :  { %v453_v14 = vld [vmem:[%s607_s1 + $0x70] sm:$0xff]   ;;  %202 = vmatprep.mubr.bf16.mxu0 %v459_v11  ;;  %210 = vmatprep.mubr.bf16.mxu1 %v462_v12  ;;  %v455_v16 = vld [vmem:[%s607_s1 + $0x78] sm:$0xff]   ;;  %v291_v49 = vld [vmem:[%s609_s3] sm:$0xff] }
   0x7   :  { %397 = vmatpush3.bf16.msra.mxu0 %v444_v3  ;;  %431 = vmatpush3.bf16.msra.mxu1 %v444_v3  ;;  %v454_v15 = vld [vmem:[%s607_s1 + $0x30] sm:$0xff]   ;;  %v456_v17 = vld [vmem:[%s607_s1 + $0x38] sm:$0xff]   ;;  %v292_v50 = vld [vmem:[%s609_s3 + $0x8] sm:$0xff] }
   0x8   :  { %398 = vmatprep.subr.bf16.mxu0 %v445_v4  ;;  %424 = vmatprep.subr.bf16.mxu1 %v445_v4  ;;  %v460_v19 = vld [vmem:[%s608_s0 + $0x10] ss:$8 sps:$4 sm:$0xff]   ;;  %v251_v0 = vld [vmem:[%s610_s2] sm:$0xff] }
   0x9   :  { %v293_v51 = vld [vmem:[%s609_s3 + $0x10] sm:$0xff]  ;;  %v294_v12 = vld [vmem:[%s609_s3 + $0x18] sm:$0xff] }
   0xa   :  { %v253_v3 = vld [vmem:[%s610_s2 + $0x10] sm:$0xff] }
   0xb   :  { %399 = vmatpush3.bf16.msra.mxu0 %v446_v5  ;;  %432 = vmatpush3.bf16.msra.mxu1 %v446_v5 }
   0xc   :  { %400 = vmatprep.subr.bf16.mxu0 %v447_v6  ;;  %425 = vmatprep.subr.bf16.mxu1 %v447_v6 }
   0xf   :  { %401 = vmatpush3.bf16.msra.mxu0 %v448_v7  ;;  %433 = vmatpush3.bf16.msra.mxu1 %v448_v7  ;;  %v252_v7 = vld [vmem:[%s610_s2 + $0x8] sm:$0xff] }
  0x10   :  { %402 = vmatprep.subr.bf16.mxu0 %v449_v8  ;;  %426 = vmatprep.subr.bf16.mxu1 %v449_v8 }
  0x13   :  { %403 = vmatpush3.bf16.msra.mxu0 %v450_v9  ;;  %434 = vmatpush3.bf16.msra.mxu1 %v450_v9 }
  0x14   :  { %404 = vmatprep.subr.bf16.mxu0 %v451_v10  ;;  %427 = vmatprep.subr.bf16.mxu1 %v451_v10  ;;  %v254_v10 = vld [vmem:[%s610_s2 + $0x18] sm:$0xff] }
  0x17   :  { %405 = vmatpush3.bf16.msra.mxu0 %v452_v13  ;;  %435 = vmatpush3.bf16.msra.mxu1 %v452_v13 }
  0x18   :  { %406 = vmatprep.subr.bf16.mxu0 %v453_v14  ;;  %428 = vmatprep.subr.bf16.mxu1 %v453_v14 }
  0x1b   :  { %407 = vmatpush3.bf16.msra.mxu0 %v454_v15  ;;  %436 = vmatpush3.bf16.msra.mxu1 %v454_v15 }
  0x1c   :  { %408 = vmatprep.subr.bf16.mxu0 %v455_v16  ;;  %429 = vmatprep.subr.bf16.mxu1 %v455_v16 }
  0x1f   :  { %409 = vmatpush3.bf16.msra.mxu0 %v456_v17  ;;  %437 = vmatpush3.bf16.msra.mxu1 %v456_v17 }
  0x22   :  { %203 = vmatmul.mubr.bf16.vlgmr.msra.gmra.mrb[0].mxu0 %v457_v18  ;;  %211 = vmatmul.mubr.bf16.vlgmr.msra.gmra.mrb[0].mxu1 %v460_v19 }
  0xf5   :  { %v410_v20 = vpop.f32.mrb[0].mxu0  ;;  %v416_v21 = vpop.f32.mrb[0].mxu1 }
  0xf6   :  { %v411_v22 = vpop.f32.mrb[1].mxu0  ;;  %v417_v23 = vpop.f32.mrb[1].mxu1 }
  0xf7   :  { %v412_v24 = vadd.f32 %v411_v22, %v410_v20  ;;  %v418_v25 = vadd.f32 %v417_v23, %v416_v21  ;;  %v413_v26 = vpop.f32.mrb[2].mxu0  ;;  %v419_v27 = vpop.f32.mrb[2].mxu1 }
  0xf8   :  { %v414_v28 = vpop.f32.mrb[3].mxu0  ;;  %v420_v29 = vpop.f32.mrb[3].mxu1 }
  0xf9   :  { %v415_v30 = vadd.f32 %v414_v28, %v413_v26  ;;  %v421_v31 = vadd.f32 %v420_v29, %v419_v27  ;;  %223 = vadd.xlane.f32.xlu1 %v418_v25  ;;  %219 = vadd.xlane.f32.xlu0 %v412_v24 }
  0xfd   :  { %225 = vadd.xlane.f32.xlu1 %v421_v31  ;;  %221 = vadd.xlane.f32.xlu0 %v415_v30 }
 0x186   :  { %v224_v32 = vpop.xlane.xlu1 %223  ;;  %v220_v33 = vpop.xlane.xlu0 %219 }
 0x187   :  { %v229_v34 = vmul.f32 0.0078125, %v224_v32  ;;  %v227_v35 = vmul.f32 0.0078125, %v220_v33 }
 0x189   :  { %v557_v36 = vsub.f32 %v412_v24, %v227_v35  ;;  %v559_v39 = vsub.f32 %v418_v25, %v229_v34 }
 0x18a   :  { %v226_v37 = vpop.xlane.xlu1 %225  ;;  %v222_v38 = vpop.xlane.xlu0 %221 }
 0x18b   :  { %v230_v40 = vmul.f32 0.0078125, %v226_v37  ;;  %v228_v41 = vmul.f32 0.0078125, %v222_v38  ;;  %v235_v42 = vmul.f32 %v557_v36, %v557_v36  ;;  %v237_v45 = vmul.f32 %v559_v39, %v559_v39 }
 0x18d   :  { %v563_v43 = vsub.f32 %v415_v30, %v228_v41  ;;  %239 = vadd.xlane.f32.xlu0 %v235_v42  ;;  %v565_v44 = vsub.f32 %v421_v31, %v230_v40 }
 0x18f   :  { %v236_v46 = vmul.f32 %v563_v43, %v563_v43  ;;  %v238_v47 = vmul.f32 %v565_v44, %v565_v44 }
 0x191   :  { %243 = vadd.xlane.f32.xlu0 %v237_v45  ;;  %241 = vadd.xlane.f32.xlu1 %v236_v46 }
 0x195   :  { %245 = vadd.xlane.f32.xlu1 %v238_v47 }
 0x1a6   :  { %297 = vperm.xlu1 %440, %v291_v49  }
 0x1aa   :  { %302 = vperm.xlu1 %440, %v292_v50  }
 0x1ae   :  { %307 = vperm.xlu1 %440, %v293_v51  }
 0x21a   :  { %v240_v52 = vpop.xlane.xlu0 %239 }
 0x21b   :  { %v247_v53 = vmul.f32 0.0078125, %v240_v52 }
 0x21d   :  { %v255_v54 = vadd.f32 1e-05, %v247_v53 }
 0x21e   :  { %v242_v55 = vpop.xlane.xlu1 %241  ;;  %v244_v56 = vpop.xlane.xlu0 %243 }
 0x21f   :  { %463 = vrsqrt.f32 %v255_v54  ;;  %v248_v57 = vmul.f32 0.0078125, %v242_v55  ;;  %v249_v58 = vmul.f32 0.0078125, %v244_v56 }
 0x221   :  { %v257_v59 = vadd.f32 1e-05, %v249_v58  ;;  %v256_v60 = vadd.f32 1e-05, %v248_v57 }
 0x222   :  { %v246_v61 = vpop.xlane.xlu1 %245 }
 0x223   :  { %v250_v62 = vmul.f32 0.0078125, %v246_v61  ;;  %465 = vrsqrt.f32 %v257_v59 }
 0x224   :  { %467 = vrsqrt.f32 %v256_v60 }
 0x225   :  { %v258_v63 = vadd.f32 1e-05, %v250_v62 }
 0x226   :  { %v298_v13 = vpop.permute.xlu1 %297 }
 0x227   :  { %469 = vrsqrt.f32 %v258_v63 }
 0x229   :  { %v464_v1 = vpop.eup %463 }
 0x22a   :  { %v263_v2 = vmul.f32 %v464_v1, %v251_v0  ;;  %v303_v14 = vpop.permute.xlu1 %302 }
 0x22c   :  { %269 = vperm.xlu0 %439, %v263_v2  }
 0x22d   :  { %v466_v4 = vpop.eup %465 }
 0x22e   :  { %v265_v5 = vmul.f32 %v466_v4, %v253_v3  ;;  %v468_v6 = vpop.eup %467  ;;  %v308_v15 = vpop.permute.xlu1 %307 }
 0x22f   :  { %v264_v8 = vmul.f32 %v468_v6, %v252_v7 }
 0x230   :  { %279 = vperm.xlu1 %440, %v265_v5  }
 0x231   :  { %v470_v9 = vpop.eup %469 }
 0x232   :  { %v266_v11 = vmul.f32 %v470_v9, %v254_v10 }
 0x234   :  { %274 = vperm.xlu1 %440, %v264_v8  }
 0x238   :  { %284 = vperm.xlu1 %440, %v266_v11  }
 0x23c   :  { %312 = vperm.xlu1 %440, %v294_v12  }
 0x2ab   :  { %v270_v16 = vpop.permute.xlu0 %269 }
 0x2ac   :  { %v287_v17 = vmul.f32 %v270_v16, %v557_v36 }
 0x2ae   :  { %v315_v19 = vadd.f32 %v298_v13, %v287_v17 }
 0x2af   :  { %v280_v18 = vpop.permute.xlu1 %279 }
 0x2b0   :  { %v289_v21 = vmul.f32 %v280_v18, %v559_v39  ;;  %v323_v23 = vmul.f32 0.2, %v315_v19  ;;  %vm319_vm0 = vcmp.ge.f32.partialorder %v315_v19, 0.0 }
 0x2b2   :  { %v317_v26 = vadd.f32 %v308_v15, %v289_v21  ;;  %v327_v28 = vsel %vm319_vm0, %v315_v19, %v323_v23 }
 0x2b3   :  { %v275_v20 = vpop.permute.xlu1 %274 }
 0x2b4   :  { %v288_v22 = vmul.f32 %v275_v20, %v563_v43  ;;  %v325_v33 = vmul.f32 0.2, %v317_v26  ;;  %vm321_vm2 = vcmp.ge.f32.partialorder %v317_v26, 0.0 }
 0x2b6   :  { %v316_v24 = vadd.f32 %v303_v14, %v288_v22  ;;  %v329_v36 = vsel %vm321_vm2, %v317_v26, %v325_v33 }
 0x2b7   :  { %v285_v25 = vpop.permute.xlu1 %284 }
 0x2b8   :  { %vm320_vm1 = vcmp.ge.f32.partialorder %v316_v24, 0.0  ;;  %v324_v27 = vmul.f32 0.2, %v316_v24  ;;  %v290_v30 = vmul.f32 %v285_v25, %v565_v44 }
 0x2ba   :  { %v328_v29 = vsel %vm320_vm1, %v316_v24, %v324_v27 }
 0x2bb   :  { %v386_v31 = vpack.c.bf16 %v328_v29, %v327_v28  ;;  %v313_v32 = vpop.permute.xlu1 %312 }
 0x2bc   :  { %v318_v34 = vadd.f32 %v313_v32, %v290_v30 }
 0x2bd   :  { %387 = vst [vmem:[%s611_s4] sm:$0xff] %v386_v31  }
 0x2be   :  { %vm322_vm3 = vcmp.ge.f32.partialorder %v318_v34, 0.0  ;;  %v326_v35 = vmul.f32 0.2, %v318_v34 }
 0x2c0   :  { %v330_v37 = vsel %vm322_vm3, %v318_v34, %v326_v35 }
 0x2c1   :  { %v391_v38 = vpack.c.bf16 %v330_v37, %v329_v36 }
 0x2c3   :  { %393 = vst [vmem:[%s611_s4 + $0x8] sm:$0xff] %v391_v38  }

// kernel: encoder_forward.7
= control target key start
LH: loop header
LB: loop body
LE: loop exit
PB: predicated region body
PF: predicated region fallthrough
CT: control target
= control target key end

     0   :  { %s3511_s0 = inlined_call_operand.vmem [shape: bf16[32,512], index: 0, kind: input, shape index: {}]   ;;  %s3512_s1 = inlined_call_operand.vmem [shape: bf16[512,64], index: 1, kind: input, shape index: {}]   ;;  %s3513_s2 = inlined_call_operand.vmem [shape: f32[1,64], index: 2, kind: input, shape index: {}]   ;;  %s3514_s3 = inlined_call_operand.vmem [shape: f32[1,64], index: 3, kind: input, shape index: {}]   ;;  %s3515_s4 = inlined_call_operand.vmem [shape: f32[16,64,16], index: 4, kind: input, shape index: {}]   ;;  %s3516_s5 = inlined_call_operand.vmem [shape: f32[1,16], index: 5, kind: input, shape index: {}]   ;;  %s3517_s6 = inlined_call_operand.hbm [shape: f32[2,16], index: 6, kind: output, shape index: {}]  }
   0x1   :  { %v2728_v0 = vld [vmem:[%s3512_s1 + $0x40] sm:$0xff]   ;;  %v2732_v4 = vld [vmem:[%s3512_s1 + $0x48] sm:$0xff]   ;;  %v2736_v8 = vld [vmem:[%s3512_s1 + $0x50] sm:$0xff]  }
   0x2   :  { %v2729_v1 = vld [vmem:[%s3512_s1 + $0xc0] sm:$0xff]   ;;  %2028 = vmatprep.subr.bf16.mxu0 %v2728_v0  ;;  %v2733_v5 = vld [vmem:[%s3512_s1 + $0xc8] sm:$0xff]   ;;  %v2737_v9 = vld [vmem:[%s3512_s1 + $0xd0] sm:$0xff]  }
   0x3   :  { %v2730_v2 = vld [vmem:[%s3512_s1] sm:$0xff]   ;;  %2056 = vmatprep.subr.bf16.mxu1 %v2729_v1  ;;  %v2734_v6 = vld [vmem:[%s3512_s1 + $0x8] sm:$0xff]   ;;  %v2738_v10 = vld [vmem:[%s3512_s1 + $0x10] sm:$0xff]  }
   0x4   :  { %v2731_v3 = vld [vmem:[%s3512_s1 + $0x80] sm:$0xff]   ;;  %2029 = vmatpush3.bf16.msra.mxu0 %v2730_v2  ;;  %v2735_v7 = vld [vmem:[%s3512_s1 + $0x88] sm:$0xff]   ;;  %v2739_v11 = vld [vmem:[%s3512_s1 + $0x90] sm:$0xff]  }
   0x5   :  { %2057 = vmatpush3.bf16.msra.mxu1 %v2731_v3  ;;  %2030 = vmatprep.subr.bf16.mxu0 %v2732_v4  ;;  %v2740_v12 = vld [vmem:[%s3512_s1 + $0x58] sm:$0xff]   ;;  %v2744_v16 = vld [vmem:[%s3512_s1 + $0x60] sm:$0xff]   ;;  %v2748_v20 = vld [vmem:[%s3512_s1 + $0x68] sm:$0xff]  }
   0x6   :  { %2058 = vmatprep.subr.bf16.mxu1 %v2733_v5  ;;  %v2741_v13 = vld [vmem:[%s3512_s1 + $0xd8] sm:$0xff]   ;;  %v2745_v17 = vld [vmem:[%s3512_s1 + $0xe0] sm:$0xff]   ;;  %v2749_v21 = vld [vmem:[%s3512_s1 + $0xe8] sm:$0xff]  }
   0x7   :  { %v2742_v14 = vld [vmem:[%s3512_s1 + $0x18] sm:$0xff]   ;;  %v2746_v18 = vld [vmem:[%s3512_s1 + $0x20] sm:$0xff]   ;;  %v2750_v22 = vld [vmem:[%s3512_s1 + $0x28] sm:$0xff]  }
   0x8   :  { %2031 = vmatpush3.bf16.msra.mxu0 %v2734_v6  ;;  %v2743_v15 = vld [vmem:[%s3512_s1 + $0x98] sm:$0xff]   ;;  %v2747_v19 = vld [vmem:[%s3512_s1 + $0xa0] sm:$0xff]   ;;  %v2751_v23 = vld [vmem:[%s3512_s1 + $0xa8] sm:$0xff]  }
   0x9   :  { %2059 = vmatpush3.bf16.msra.mxu1 %v2735_v7  ;;  %2032 = vmatprep.subr.bf16.mxu0 %v2736_v8  ;;  %v2752_v24 = vld [vmem:[%s3512_s1 + $0x70] sm:$0xff]   ;;  %v2756_v28 = vld [vmem:[%s3512_s1 + $0x78] sm:$0xff]  }
   0xa   :  { %2060 = vmatprep.subr.bf16.mxu1 %v2737_v9  ;;  %v2753_v25 = vld [vmem:[%s3512_s1 + $0xf0] sm:$0xff]   ;;  %v2757_v29 = vld [vmem:[%s3512_s1 + $0xf8] sm:$0xff]  }
   0xb   :  { %v2754_v26 = vld [vmem:[%s3512_s1 + $0x30] sm:$0xff]   ;;  %v2758_v30 = vld [vmem:[%s3512_s1 + $0x38] sm:$0xff]  }
   0xc   :  { %2033 = vmatpush3.bf16.msra.mxu0 %v2738_v10  ;;  %v2755_v27 = vld [vmem:[%s3512_s1 + $0xb0] sm:$0xff]   ;;  %v2759_v31 = vld [vmem:[%s3512_s1 + $0xb8] sm:$0xff]  }
   0xd   :  { %2061 = vmatpush3.bf16.msra.mxu1 %v2739_v11  ;;  %2034 = vmatprep.subr.bf16.mxu0 %v2740_v12  ;;  %v2760_v32 = vld [vmem:[%s3511_s0] ss:$16 sps:$4 sm:$0xff]   ;;  %v2762_v33 = vld [vmem:[%s3511_s0 + $0x4] ss:$16 sps:$4 sm:$0xff]   ;;  %v2763_v34 = vld [vmem:[%s3511_s0 + $0x8] ss:$16 sps:$4 sm:$0xff]  }
   0xe   :  { %2062 = vmatprep.subr.bf16.mxu1 %v2741_v13  ;;  %v2765_v35 = vld [vmem:[%s3511_s0 + $0xc] ss:$16 sps:$4 sm:$0xff]   ;;  %361 = vmatprep.mubr.bf16.mxu0 %v2762_v33  ;;  %v2766_v36 = vld [vmem:[%s3511_s0 + $0x24] ss:$16 sps:$4 sm:$0xff]  }
   0xf   :  { %410 = vmatprep.mubr.bf16.mxu1 %v2765_v35  ;;  %v2768_v37 = vld [vmem:[%s3511_s0 + $0x2c] ss:$16 sps:$4 sm:$0xff]  }
  0x10   :  { %2035 = vmatpush3.bf16.msra.mxu0 %v2742_v14 }
  0x11   :  { %2063 = vmatpush3.bf16.msra.mxu1 %v2743_v15  ;;  %2036 = vmatprep.subr.bf16.mxu0 %v2744_v16 }
  0x12   :  { %2064 = vmatprep.subr.bf16.mxu1 %v2745_v17 }
  0x14   :  { %2037 = vmatpush3.bf16.msra.mxu0 %v2746_v18 }
  0x15   :  { %2065 = vmatpush3.bf16.msra.mxu1 %v2747_v19  ;;  %2038 = vmatprep.subr.bf16.mxu0 %v2748_v20 }
  0x16   :  { %2066 = vmatprep.subr.bf16.mxu1 %v2749_v21 }
  0x18   :  { %2039 = vmatpush3.bf16.msra.mxu0 %v2750_v22 }
  0x19   :  { %2067 = vmatpush3.bf16.msra.mxu1 %v2751_v23  ;;  %2040 = vmatprep.subr.bf16.mxu0 %v2752_v24 }
  0x1a   :  { %2068 = vmatprep.subr.bf16.mxu1 %v2753_v25 }
  0x1c   :  { %2041 = vmatpush3.bf16.msra.mxu0 %v2754_v26 }
  0x1d   :  { %2069 = vmatpush3.bf16.msra.mxu1 %v2755_v27  ;;  %2042 = vmatprep.subr.bf16.mxu0 %v2756_v28 }
  0x1e   :  { %2070 = vmatprep.subr.bf16.mxu1 %v2757_v29 }
  0x20   :  { %2043 = vmatpush3.bf16.msra.mxu0 %v2758_v30 }
  0x21   :  { %2071 = vmatpush3.bf16.msra.mxu1 %v2759_v31 }
  0x23   :  { %362 = vmatmul.mubr.bf16.vlgmr.msra.gmra.mrb[0].mxu0 %v2760_v32 }
  0x24   :  { %411 = vmatmul.mubr.bf16.vlgmr.msra.gmra.mrb[0].mxu1 %v2763_v34  ;;  %369 = vmatprep.mubr.bf16.mxu0 %v2766_v36 }
  0x25   :  { %11 = vsyncpa [#allocation3], 0  ;;  %418 = vmatprep.mubr.bf16.mxu1 %v2768_v37  ;;  %v2770_v38 = vld [vmem:[%s3511_s0 + $0x20] ss:$16 sps:$4 sm:$0xff]   ;;  %v2771_v39 = vld [vmem:[%s3511_s0 + $0x28] ss:$16 sps:$4 sm:$0xff]  }
  0x26   :  { %v501_v40 = vld [vmem:[%s3515_s4] sm:$0xff]  ;;  %v502_v41 = vld [vmem:[%s3515_s4 + $0x8] sm:$0xff]  ;;  %v2798_v43 = vmov 0.0|0.0   ;;  %v503_v47 = vld [vmem:[%s3515_s4 + $0x10] sm:$0xff]  ;;  %vm2799_vm0 = vmmov 0   ;;  %v2800_v1 = vmov 0.0  }
  0x27   :  { %v2545_v42 = vpack.c.bf16 %v502_v41, %v501_v40  ;;  %2544 = vmatprep.subr.bf16.mxu1 %v2798_v43  ;;  %2532 = vmatprep.subr.bf16.mxu0 %v2798_v43  ;;  %v1891_v44 = vld [vmem:[%s3515_s4 + $0x40] sm:$0xff]  ;;  %v1892_v45 = vld [vmem:[%s3515_s4 + $0x48] sm:$0xff]  ;;  %v504_v48 = vld [vmem:[%s3515_s4 + $0x18] sm:$0xff]  ;;  %vm427_vm1 = vcmask 523264   ;;  %s2801_s14 = smov [#allocation2]   ;;  %vm1834_vm6 = vcmask 123904  }
  0x28   :  { %v2533_v46 = vpack.c.bf16 %v1892_v45, %v1891_v44  ;;  %v2548_v49 = vpack.c.bf16 %v504_v48, %v503_v47  ;;  %v1893_v50 = vld [vmem:[%s3515_s4 + $0x50] sm:$0xff]  ;;  %v1894_v51 = vld [vmem:[%s3515_s4 + $0x58] sm:$0xff]  ;;  %v505_v53 = vld [vmem:[%s3515_s4 + $0x20] sm:$0xff] }
  0x29   :  { %2546 = vmatpush3.bf16.msra.mxu1 %v2545_v42  ;;  %v2536_v52 = vpack.c.bf16 %v1894_v51, %v1893_v50  ;;  %v506_v54 = vld [vmem:[%s3515_s4 + $0x28] sm:$0xff]  ;;  %v1895_v56 = vld [vmem:[%s3515_s4 + $0x60] sm:$0xff]  ;;  %v507_v59 = vld [vmem:[%s3515_s4 + $0x30] sm:$0xff] }
  0x2a   :  { %2547 = vmatprep.subr.bf16.mxu1 %v2798_v43  ;;  %2534 = vmatpush3.bf16.msra.mxu0 %v2533_v46  ;;  %v2551_v55 = vpack.c.bf16 %v506_v54, %v505_v53  ;;  %v1896_v57 = vld [vmem:[%s3515_s4 + $0x68] sm:$0xff]  ;;  %v508_v60 = vld [vmem:[%s3515_s4 + $0x38] sm:$0xff]  ;;  %v1897_v62 = vld [vmem:[%s3515_s4 + $0x70] sm:$0xff] }
  0x2b   :  { %370 = vmatmul.mubr.bf16.gmra.mrb[4].mxu0 %v2770_v38  ;;  %2535 = vmatprep.subr.bf16.mxu0 %v2798_v43  ;;  %v2539_v58 = vpack.c.bf16 %v1896_v57, %v1895_v56  ;;  %v2554_v61 = vpack.c.bf16 %v508_v60, %v507_v59  ;;  %v1898_v63 = vld [vmem:[%s3515_s4 + $0x78] sm:$0xff] }
  0x2c   :  { %419 = vmatmul.mubr.bf16.gmra.mrb[4].mxu1 %v2771_v39  ;;  %v2542_v0 = vpack.c.bf16 %v1898_v63, %v1897_v62  ;;  %2244 = vmatprep.mubr.msk.f32.mxu0 %vm2799_vm0, %v2800_v1 }
  0x2d   :  { %2549 = vmatpush3.bf16.msra.mxu1 %v2548_v49  ;;  %2263 = vmatprep.mubr.msk.f32.mxu1 %vm2799_vm0, %v2800_v1 }
  0x2e   :  { %2550 = vmatprep.subr.bf16.mxu1 %v2798_v43  ;;  %2537 = vmatpush3.bf16.msra.mxu0 %v2536_v52 }
  0x2f   :  { %2538 = vmatprep.subr.bf16.mxu0 %v2798_v43 }
  0x31   :  { %2552 = vmatpush3.bf16.msra.mxu1 %v2551_v55 }
  0x32   :  { %2553 = vmatprep.subr.bf16.mxu1 %v2798_v43  ;;  %2540 = vmatpush3.bf16.msra.mxu0 %v2539_v58 }
  0x33   :  { %2541 = vmatprep.subr.bf16.mxu0 %v2798_v43 }
  0x35   :  { %2555 = vmatpush3.bf16.msra.mxu1 %v2554_v61 }
  0x36   :  { %2568 = vmatprep.subr.bf16.mxu1 %v2798_v43  ;;  %2543 = vmatpush3.bf16.msra.mxu0 %v2542_v0 }
  0x37   :  { %2556 = vmatprep.subr.bf16.mxu0 %v2798_v43 }
  0xf6   :  { %v2044_v2 = vpop.f32.mrb[0].mxu0 }
  0xf7   :  { %v2072_v3 = vpop.f32.mrb[0].mxu1  ;;  %v2045_v4 = vpop.f32.mrb[1].mxu0 }
  0xf8   :  { %v2046_v5 = vadd.f32 %v2045_v4, %v2044_v2  ;;  %v2073_v6 = vpop.f32.mrb[1].mxu1  ;;  %v2047_v7 = vpop.f32.mrb[2].mxu0 }
  0xf9   :  { %v2074_v8 = vadd.f32 %v2073_v6, %v2072_v3  ;;  %v2075_v9 = vpop.f32.mrb[2].mxu1  ;;  %v2048_v10 = vpop.f32.mrb[3].mxu0 }
  0xfa   :  { %v2049_v11 = vadd.f32 %v2048_v10, %v2047_v7  ;;  %v2076_v12 = vpop.f32.mrb[3].mxu1  ;;  %v464_v7 = vld [vmem:[%s3513_s2] sm:$0x1]  ;;  %s1842_s2 = sshll.u32 %s2801_s14, 4  ;;  %s1843_s2 = int_to_ptr.vmem [resolvable:$true] %s1842_s2 }
  0xfb   :  { %v413_v13 = vadd.f32 %v2074_v8, %v2046_v5  ;;  %v2077_v14 = vadd.f32 %v2076_v12, %v2075_v9  ;;  %v469_v5 = vlaneseq  ;;  %v3033_v12 = vld [vmem:[%s3514_s3] ss:$0 sm:$0xff]  ;;  %s2774_s15 = scalar_lea.vmem %s1843_s2, 32  ;;  %p2779_p1 = scmp.lt.s32.totalorder %s1843_s2, %s1843_s2 }
  0xfc   :  { %p2775_p0 = scmp.ne.s32.totalorder %s1843_s2, %s2774_s15  ;;  %p2780_p2 = scmp.lt.s32.totalorder %s2774_s15, %s2774_s15 }
  0xfd   :  { %v416_v15 = vadd.f32 %v2077_v14, %v2049_v11  ;;  %v428_v17 = vsel %vm427_vm1, %v413_v13, 0.0  ;;  %v470_v6 = vshrl.u32 %v469_v5, 7  ;;  %v1935_v5 = vld [vmem:[%s3515_s4 + $0x178] sm:$0xff] }
  0xfe   :  { %v2050_v16 = vpop.f32.mrb[4].mxu0  ;;  %p2781_p3 = por %p2780_p2, %p2779_p1 }
  0xff   :  { %v429_v18 = vsel %vm427_vm1, %v416_v15, 0.0  ;;  %v2078_v19 = vpop.f32.mrb[4].mxu1  ;;  %v2051_v20 = vpop.f32.mrb[5].mxu0  ;;  %v471_v8 = vsub.s32 0, %v470_v6 }
 0x100   :  { %v430_v21 = vadd.f32 %v429_v18, %v428_v17  ;;  %v2052_v22 = vadd.f32 %v2051_v20, %v2050_v16  ;;  %v2079_v23 = vpop.f32.mrb[5].mxu1  ;;  %v2053_v24 = vpop.f32.mrb[6].mxu0  ;;  %v1910_v17 = vld [vmem:[%s3515_s4 + $0xc0] sm:$0xff]  ;;  %v1911_v18 = vld [vmem:[%s3515_s4 + $0xc8] sm:$0xff]  ;;  %p2782_p4 = pnand %p2781_p3, %p2775_p0 }
 0x101   :  { %v2080_v25 = vadd.f32 %v2079_v23, %v2078_v19  ;;  %v2081_v26 = vpop.f32.mrb[6].mxu1  ;;  %v2054_v27 = vpop.f32.mrb[7].mxu0 }
 0x102   :  { %v2055_v28 = vadd.f32 %v2054_v27, %v2053_v24  ;;  %v2082_v29 = vpop.f32.mrb[7].mxu1  ;;  %v2569_v24 = vpack.c.bf16 %v1911_v18, %v1910_v17  ;;  %v1937_v17 = vld [vmem:[%s3515_s4 + $0x180] sm:$0xff]  ;;  %v1938_v18 = vld [vmem:[%s3515_s4 + $0x188] sm:$0xff] }
 0x103   :  { %v421_v30 = vadd.f32 %v2080_v25, %v2052_v22  ;;  %v2083_v31 = vadd.f32 %v2082_v29, %v2081_v26  ;;  %v1902_v22 = vld [vmem:[%s3515_s4 + $0x88] sm:$0xff]  ;;  %v1912_v25 = vld [vmem:[%s3515_s4 + $0xd0] sm:$0xff]  ;;  %v1913_v26 = vld [vmem:[%s3515_s4 + $0xd8] sm:$0xff] }
 0x105   :  { %v431_v32 = vsel %vm427_vm1, %v421_v30, 0.0  ;;  %v424_v33 = vadd.f32 %v2083_v31, %v2055_v28  ;;  %v1904_v31 = vld [vmem:[%s3515_s4 + $0x98] sm:$0xff] }
 0x106   :  { %v432_v34 = vadd.f32 %v431_v32, %v430_v21  ;;  %v1901_v21 = vld [vmem:[%s3515_s4 + $0x80] sm:$0xff]  ;;  %v2572_v32 = vpack.c.bf16 %v1913_v26, %v1912_v25  ;;  %v1939_v25 = vld [vmem:[%s3515_s4 + $0x190] sm:$0xff]  ;;  %v1940_v26 = vld [vmem:[%s3515_s4 + $0x198] sm:$0xff] }
 0x107   :  { %v433_v35 = vsel %vm427_vm1, %v424_v33, 0.0  ;;  %v2557_v28 = vpack.c.bf16 %v1902_v22, %v1901_v21  ;;  %v1948_v22 = vld [vmem:[%s3515_s4 + $0x1d0] sm:$0xff] }
 0x108   :  { %v434_v36 = vadd.f32 %v433_v35, %v432_v34  ;;  %v1915_v34 = vld [vmem:[%s3515_s4 + $0xe8] sm:$0xff] }
 0x10a   :  { %v435_v37 = vrot.slane %v434_v36, 4 }
 0x10c   :  { %v436_v38 = vadd.f32 %v435_v37, %v434_v36  ;;  %v1905_v36 = vld [vmem:[%s3515_s4 + $0xa0] sm:$0xff]  ;;  %v1906_v37 = vld [vmem:[%s3515_s4 + $0xa8] sm:$0xff] }
 0x10e   :  { %v437_v39 = vrot.slane %v436_v38, 2 }
 0x110   :  { %v438_v40 = vadd.f32 %v437_v39, %v436_v38  ;;  %v1916_v39 = vld [vmem:[%s3515_s4 + $0xf0] sm:$0xff] }
 0x112   :  { %v439_v41 = vrot.slane %v438_v40, 1 }
 0x114   :  { %v440_v42 = vadd.f32 %v439_v41, %v438_v40  ;;  %v1917_v40 = vld [vmem:[%s3515_s4 + $0xf8] sm:$0xff]  ;;  %v2563_v41 = vpack.c.bf16 %v1906_v37, %v1905_v36  ;;  %v1943_v37 = vld [vmem:[%s3515_s4 + $0x1b0] sm:$0xff] }
 0x116   :  { %v441_v44 = vmul.f32 0.03125, %v440_v42  ;;  %v1907_v42 = vld [vmem:[%s3515_s4 + $0xb0] sm:$0xff] }
 0x118   :  { %v442_v45 = vsub.f32 %v413_v13, %v441_v44  ;;  %v443_v46 = vsub.f32 %v416_v15, %v441_v44  ;;  %v444_v47 = vsub.f32 %v421_v30, %v441_v44  ;;  %v445_v48 = vsub.f32 %v424_v33, %v441_v44  ;;  %v1903_v30 = vld [vmem:[%s3515_s4 + $0x90] sm:$0xff]  ;;  %v1914_v33 = vld [vmem:[%s3515_s4 + $0xe0] sm:$0xff]  ;;  %v1908_v44 = vld [vmem:[%s3515_s4 + $0xb8] sm:$0xff] }
 0x119   :  { %v2560_v35 = vpack.c.bf16 %v1904_v31, %v1903_v30  ;;  %v2575_v38 = vpack.c.bf16 %v1915_v34, %v1914_v33  ;;  %v2608_v30 = vpack.c.bf16 %v1940_v26, %v1939_v25  ;;  %v1941_v31 = vld [vmem:[%s3515_s4 + $0x1a0] sm:$0xff]  ;;  %v1952_v34 = vld [vmem:[%s3515_s4 + $0x1f0] sm:$0xff]  ;;  %v1978_v25 = vld [vmem:[%s3515_s4 + $0x2a8] sm:$0xff] }
 0x11a   :  { %v446_v49 = vmul.f32 %v442_v45, %v442_v45  ;;  %v447_v50 = vmul.f32 %v443_v46, %v443_v46  ;;  %v448_v51 = vmul.f32 %v444_v47, %v444_v47  ;;  %v449_v52 = vmul.f32 %v445_v48, %v445_v48 }
 0x11c   :  { %v450_v53 = vsel %vm427_vm1, %v446_v49, 0.0  ;;  %v451_v54 = vsel %vm427_vm1, %v447_v50, 0.0  ;;  %v453_v56 = vsel %vm427_vm1, %v448_v51, 0.0  ;;  %v455_v58 = vsel %vm427_vm1, %v449_v52, 0.0  ;;  %v1919_v49 = vld [vmem:[%s3515_s4 + $0x100] sm:$0xff]  ;;  %v1920_v50 = vld [vmem:[%s3515_s4 + $0x108] sm:$0xff] }
 0x11d   :  { %v452_v55 = vadd.f32 %v451_v54, %v450_v53  ;;  %v1930_v53 = vld [vmem:[%s3515_s4 + $0x150] sm:$0xff]  ;;  %v1931_v54 = vld [vmem:[%s3515_s4 + $0x158] sm:$0xff] }
 0x11f   :  { %v454_v57 = vadd.f32 %v453_v56, %v452_v55  ;;  %v2581_v55 = vpack.c.bf16 %v1920_v50, %v1919_v49  ;;  %v1967_v49 = vld [vmem:[%s3515_s4 + $0x258] sm:$0xff] }
 0x121   :  { %v456_v59 = vadd.f32 %v455_v58, %v454_v57  ;;  %v1921_v57 = vld [vmem:[%s3515_s4 + $0x110] sm:$0xff]  ;;  %v1922_v58 = vld [vmem:[%s3515_s4 + $0x118] sm:$0xff] }
 0x123   :  { %v457_v60 = vrot.slane %v456_v59, 4 }
 0x125   :  { %v458_v61 = vadd.f32 %v457_v60, %v456_v59  ;;  %v2596_v59 = vpack.c.bf16 %v1931_v54, %v1930_v53  ;;  %v1932_v60 = vld [vmem:[%s3515_s4 + $0x160] sm:$0xff]  ;;  %v1958_v53 = vld [vmem:[%s3515_s4 + $0x218] sm:$0xff] }
 0x127   :  { %v459_v62 = vrot.slane %v458_v61, 2 }
 0x129   :  { %v460_v63 = vadd.f32 %v459_v62, %v458_v61  ;;  %v1933_v61 = vld [vmem:[%s3515_s4 + $0x168] sm:$0xff] }
 0x12b   :  { %v461_v0 = vrot.slane %v460_v63, 1 }
 0x12d   :  { %v462_v2 = vadd.f32 %v461_v0, %v460_v63  ;;  %v2584_v63 = vpack.c.bf16 %v1922_v58, %v1921_v57  ;;  %v1923_v0 = vld [vmem:[%s3515_s4 + $0x120] sm:$0xff] }
 0x12f   :  { %v463_v3 = vmul.f32 0.03125, %v462_v2  ;;  %v1924_v2 = vld [vmem:[%s3515_s4 + $0x128] sm:$0xff] }
 0x130   :  { %v2587_v6 = vpack.c.bf16 %v1924_v2, %v1923_v0  ;;  %v1961_v0 = vld [vmem:[%s3515_s4 + $0x230] sm:$0xff]  ;;  %v1962_v2 = vld [vmem:[%s3515_s4 + $0x238] sm:$0xff] }
 0x131   :  { %v465_v4 = vadd.f32 1e-05, %v463_v3  ;;  %v2599_v3 = vpack.c.bf16 %v1933_v61, %v1932_v60  ;;  %v1960_v60 = vld [vmem:[%s3515_s4 + $0x228] sm:$0xff] }
 0x133   :  { %2772 = vrsqrt.f32 %v465_v4  ;;  %v1934_v4 = vld [vmem:[%s3515_s4 + $0x170] sm:$0xff] }
 0x13d   :  { %v2773_v9 = vpop.eup %2772 }
 0x13e   :  { %v467_v10 = vmul.f32 %v2773_v9, %v464_v7  ;;  %v1926_v9 = vld [vmem:[%s3515_s4 + $0x138] sm:$0xff] }
 0x140   :  { %v472_v11 = vrot.slane %v467_v10, %v471_v8  ;;  %v1925_v8 = vld [vmem:[%s3515_s4 + $0x130] sm:$0xff]  ;;  %v2602_v10 = vpack.c.bf16 %v1935_v5, %v1934_v4  ;;  %v1982_v4 = vld [vmem:[%s3515_s4 + $0x2c0] sm:$0xff]  ;;  %v1983_v5 = vld [vmem:[%s3515_s4 + $0x2c8] sm:$0xff] }
 0x142   :  { %v3035_v13 = vmul.f32 %v472_v11, %v443_v46  ;;  %v3037_v14 = vmul.f32 %v472_v11, %v444_v47  ;;  %v477_v15 = vmul.f32 %v472_v11, %v445_v48  ;;  %v474_v16 = vmul.f32 %v472_v11, %v442_v45  ;;  %v1928_v46 = vld [vmem:[%s3515_s4 + $0x140] sm:$0xff]  ;;  %v1929_v47 = vld [vmem:[%s3515_s4 + $0x148] sm:$0xff] }
 0x143   :  { %v2578_v45 = vpack.c.bf16 %v1917_v40, %v1916_v39  ;;  %v2566_v48 = vpack.c.bf16 %v1908_v44, %v1907_v42  ;;  %v2593_v51 = vpack.c.bf16 %v1929_v47, %v1928_v46  ;;  %v1946_v11 = vld [vmem:[%s3515_s4 + $0x1c0] sm:$0xff] }
 0x144   :  { %v3046_v19 = vadd.f32 %v3033_v12, %v477_v15  ;;  %v485_v20 = vadd.f32 %v3033_v12, %v474_v16  ;;  %v486_v62 = vadd.f32 %v3033_v12, %v3035_v13  ;;  %v1947_v13 = vld [vmem:[%s3515_s4 + $0x1c8] sm:$0xff]  ;;  %v2590_v15 = vpack.c.bf16 %v1926_v9, %v1925_v8  ;;  %v1964_v40 = vld [vmem:[%s3515_s4 + $0x240] sm:$0xff] }
 0x145   :  { %v1955_v44 = vld [vmem:[%s3515_s4 + $0x200] sm:$0xff]  ;;  %v487_v57 = vadd.f32 %v3033_v12, %v3037_v14  ;;  %v1970_v12 = vld [vmem:[%s3515_s4 + $0x270] sm:$0xff]  ;;  %v1971_v14 = vld [vmem:[%s3515_s4 + $0x278] sm:$0xff] }
 0x146   :  { %vm489_vm2 = vcmp.ge.f32.partialorder %v485_v20, 0.0  ;;  %v493_v23 = vmul.f32 0.2, %v485_v20  ;;  %v494_v7 = vmul.f32 0.2, %v486_v62  ;;  %vm490_vm3 = vcmp.ge.f32.partialorder %v486_v62, 0.0 }
 0x147   :  { %vm491_vm4 = vcmp.ge.f32.partialorder %v487_v57, 0.0  ;;  %v1973_v8 = vld [vmem:[%s3515_s4 + $0x280] sm:$0xff]  ;;  %v1974_v9 = vld [vmem:[%s3515_s4 + $0x288] sm:$0xff]  ;;  %vm492_vm5 = vcmp.ge.f32.partialorder %v3046_v19, 0.0 }
 0x148   :  { %v497_v27 = vsel %vm489_vm2, %v485_v20, %v493_v23  ;;  %v3172_v16 = vsel %vm490_vm3, %v486_v62, %v494_v7  ;;  %v2617_v20 = vpack.c.bf16 %v1947_v13, %v1946_v11  ;;  %v1949_v23 = vld [vmem:[%s3515_s4 + $0x1d8] sm:$0xff]  ;;  %v1984_v13 = vld [vmem:[%s3515_s4 + $0x2d0] sm:$0xff] }
 0x149   :  { %v519_v29 = vrot.slane %v497_v27, 2  ;;  %2264 = vmatmul.mubr.msk.f32.vlgmr.msra.gmra.mrb[8].mxu1 %vm427_vm1, %v497_v27  ;;  %v756_v52 = vrot.slane %v497_v27, 6  ;;  %v673_v56 = vrot.slane %v497_v27, 4  ;;  %v922_v21 = vrot.slane %v3172_v16, 2 }
 0x14a   :  { %2570 = vmatpush3.bf16.msra.mxu1 %v2569_v24  ;;  %2301 = vmatprep.mubr.msk.f32.mxu1 %vm2799_vm0, %v2800_v1  ;;  %v2605_v24 = vpack.c.bf16 %v1938_v18, %v1937_v17  ;;  %v2620_v27 = vpack.c.bf16 %v1949_v23, %v1948_v22  ;;  %v1088_v47 = vrot.slane %v3172_v16, 6  ;;  %v1975_v17 = vld [vmem:[%s3515_s4 + $0x290] sm:$0xff]  ;;  %v1976_v18 = vld [vmem:[%s3515_s4 + $0x298] sm:$0xff]  ;;  %v1987_v22 = vld [vmem:[%s3515_s4 + $0x2e8] sm:$0xff] }
 0x14b   :  { %2245 = vmatmul.mubr.msk.f32.vlgmr.msra.gmra.mrb[8].mxu0 %vm427_vm1, %v519_v29  ;;  %2571 = vmatprep.subr.bf16.mxu1 %v2798_v43  ;;  %v1951_v29 = vld [vmem:[%s3515_s4 + $0x1e8] sm:$0xff]  ;;  %v2656_v23 = vpack.c.bf16 %v1976_v18, %v1975_v17  ;;  %v2024_v17 = vld [vmem:[%s3515_s4 + $0x3f0] sm:$0xff] }
 0x14c   :  { %2558 = vmatpush3.bf16.msra.mxu0 %v2557_v28  ;;  %2282 = vmatprep.mubr.msk.f32.mxu0 %vm2799_vm0, %v2800_v1  ;;  %v1950_v28 = vld [vmem:[%s3515_s4 + $0x1e0] sm:$0xff] }
 0x14d   :  { %2559 = vmatprep.subr.bf16.mxu0 %v2798_v43  ;;  %v2623_v33 = vpack.c.bf16 %v1951_v29, %v1950_v28  ;;  %v1989_v28 = vld [vmem:[%s3515_s4 + $0x2f8] sm:$0xff] }
 0x14e   :  { %2573 = vmatpush3.bf16.msra.mxu1 %v2572_v32  ;;  %v1942_v32 = vld [vmem:[%s3515_s4 + $0x1a8] sm:$0xff] }
 0x14f   :  { %2574 = vmatprep.subr.bf16.mxu1 %v2798_v43  ;;  %v2611_v36 = vpack.c.bf16 %v1942_v32, %v1941_v31  ;;  %v1980_v31 = vld [vmem:[%s3515_s4 + $0x2b8] sm:$0xff] }
 0x150   :  { %2561 = vmatpush3.bf16.msra.mxu0 %v2560_v35  ;;  %v1953_v35 = vld [vmem:[%s3515_s4 + $0x1f8] sm:$0xff] }
 0x151   :  { %2562 = vmatprep.subr.bf16.mxu0 %v2798_v43  ;;  %v2626_v39 = vpack.c.bf16 %v1953_v35, %v1952_v34  ;;  %v2001_v34 = vld [vmem:[%s3515_s4 + $0x348] sm:$0xff] }
 0x152   :  { %2576 = vmatpush3.bf16.msra.mxu1 %v2575_v38  ;;  %v1944_v38 = vld [vmem:[%s3515_s4 + $0x1b8] sm:$0xff] }
 0x153   :  { %2577 = vmatprep.subr.bf16.mxu1 %v2798_v43  ;;  %v2614_v42 = vpack.c.bf16 %v1944_v38, %v1943_v37  ;;  %v1992_v37 = vld [vmem:[%s3515_s4 + $0x308] sm:$0xff] }
 0x154   :  { %2564 = vmatpush3.bf16.msra.mxu0 %v2563_v41  ;;  %v1965_v41 = vld [vmem:[%s3515_s4 + $0x248] sm:$0xff] }
 0x155   :  { %2565 = vmatprep.subr.bf16.mxu0 %v2798_v43  ;;  %v2641_v46 = vpack.c.bf16 %v1965_v41, %v1964_v40  ;;  %v2002_v40 = vld [vmem:[%s3515_s4 + $0x350] sm:$0xff]  ;;  %v2003_v41 = vld [vmem:[%s3515_s4 + $0x358] sm:$0xff] }
 0x156   :  { %2579 = vmatpush3.bf16.msra.mxu1 %v2578_v45  ;;  %v1956_v45 = vld [vmem:[%s3515_s4 + $0x208] sm:$0xff] }
 0x157   :  { %2592 = vmatprep.subr.bf16.mxu1 %v2798_v43  ;;  %v2629_v50 = vpack.c.bf16 %v1956_v45, %v1955_v44  ;;  %v1993_v45 = vld [vmem:[%s3515_s4 + $0x310] sm:$0xff] }
 0x158   :  { %2567 = vmatpush3.bf16.msra.mxu0 %v2566_v48  ;;  %v1966_v48 = vld [vmem:[%s3515_s4 + $0x250] sm:$0xff] }
 0x159   :  { %2302 = vmatmul.mubr.msk.f32.vlgmr.msra.gmra.mrb[10].mxu1 %vm427_vm1, %v756_v52  ;;  %2580 = vmatprep.subr.bf16.mxu0 %v2798_v43  ;;  %v1957_v52 = vld [vmem:[%s3515_s4 + $0x210] sm:$0xff]  ;;  %v2644_v54 = vpack.c.bf16 %v1967_v49, %v1966_v48  ;;  %v2004_v48 = vld [vmem:[%s3515_s4 + $0x360] sm:$0xff]  ;;  %v2005_v49 = vld [vmem:[%s3515_s4 + $0x368] sm:$0xff] }
 0x15a   :  { %2594 = vmatpush3.bf16.msra.mxu1 %v2593_v51  ;;  %2339 = vmatprep.mubr.msk.f32.mxu1 %vm2799_vm0, %v2800_v1  ;;  %v1005_v51 = vrot.slane %v3172_v16, 4  ;;  %v2632_v58 = vpack.c.bf16 %v1958_v53, %v1957_v52  ;;  %v1996_v52 = vld [vmem:[%s3515_s4 + $0x328] sm:$0xff]  ;;  %v2695_v53 = vpack.c.bf16 %v2005_v49, %v2004_v48 }
 0x15b   :  { %2283 = vmatmul.mubr.msk.f32.vlgmr.msra.gmra.mrb[10].mxu0 %vm427_vm1, %v673_v56  ;;  %2595 = vmatprep.subr.bf16.mxu1 %v2798_v43  ;;  %v1969_v56 = vld [vmem:[%s3515_s4 + $0x268] sm:$0xff] }
 0x15c   :  { %2582 = vmatpush3.bf16.msra.mxu0 %v2581_v55  ;;  %2320 = vmatprep.mubr.msk.f32.mxu0 %vm2799_vm0, %v2800_v1  ;;  %v1968_v55 = vld [vmem:[%s3515_s4 + $0x260] sm:$0xff] }
 0x15d   :  { %2583 = vmatprep.subr.bf16.mxu0 %v2798_v43  ;;  %v2647_v61 = vpack.c.bf16 %v1969_v56, %v1968_v55  ;;  %v2007_v55 = vld [vmem:[%s3515_s4 + $0x378] sm:$0xff]  ;;  %v496_v56 = vmul.f32 0.2, %v3046_v19 }
 0x15e   :  { %2597 = vmatpush3.bf16.msra.mxu1 %v2596_v59  ;;  %v1959_v59 = vld [vmem:[%s3515_s4 + $0x220] sm:$0xff] }
 0x15f   :  { %2598 = vmatprep.subr.bf16.mxu1 %v2798_v43  ;;  %v2635_v62 = vpack.c.bf16 %v1960_v60, %v1959_v59  ;;  %v1998_v59 = vld [vmem:[%s3515_s4 + $0x338] sm:$0xff] }
 0x160   :  { %2585 = vmatpush3.bf16.msra.mxu0 %v2584_v63  ;;  %v495_v63 = vmul.f32 0.2, %v487_v57 }
 0x161   :  { %2586 = vmatprep.subr.bf16.mxu0 %v2798_v43 }
 0x162   :  { %2600 = vmatpush3.bf16.msra.mxu1 %v2599_v3  ;;  %v2650_v3 = vpack.c.bf16 %v1971_v14, %v1970_v12  ;;  %v3304_v7 = vsel %vm491_vm4, %v487_v57, %v495_v63  ;;  %v2019_v12 = vld [vmem:[%s3515_s4 + $0x3c8] sm:$0xff]  ;;  %v500_v14 = vsel %vm492_vm5, %v3046_v19, %v496_v56  ;;  %v2009_v63 = vld [vmem:[%s3515_s4 + $0x380] sm:$0xff]  ;;  %v2020_v19 = vld [vmem:[%s3515_s4 + $0x3d0] sm:$0xff] }
 0x163   :  { %2601 = vmatprep.subr.bf16.mxu1 %v2798_v43  ;;  %v1254_v11 = vrot.slane %v3304_v7, 2  ;;  %v1337_v44 = vrot.slane %v3304_v7, 4 }
 0x164   :  { %2588 = vmatpush3.bf16.msra.mxu0 %v2587_v6  ;;  %v2638_v6 = vpack.c.bf16 %v1962_v2, %v1961_v0  ;;  %v2010_v0 = vld [vmem:[%s3515_s4 + $0x388] sm:$0xff] }
 0x165   :  { %2589 = vmatprep.subr.bf16.mxu0 %v2798_v43 }
 0x166   :  { %2603 = vmatpush3.bf16.msra.mxu1 %v2602_v10  ;;  %v2665_v10 = vpack.c.bf16 %v1983_v5, %v1982_v4  ;;  %v2021_v4 = vld [vmem:[%s3515_s4 + $0x3d8] sm:$0xff]  ;;  %v2701_v5 = vpack.c.bf16 %v2010_v0, %v2009_v63 }
 0x167   :  { %2616 = vmatprep.subr.bf16.mxu1 %v2798_v43 }
 0x168   :  { %2591 = vmatpush3.bf16.msra.mxu0 %v2590_v15  ;;  %v1985_v15 = vld [vmem:[%s3515_s4 + $0x2d8] sm:$0xff] }
 0x169   :  { %2340 = vmatmul.mubr.msk.f32.vlgmr.msra.gmra.mrb[12].mxu1 %vm427_vm1, %v922_v21  ;;  %2604 = vmatprep.subr.bf16.mxu0 %v2798_v43  ;;  %v1986_v21 = vld [vmem:[%s3515_s4 + $0x2e0] sm:$0xff] }
 0x16a   :  { %2618 = vmatpush3.bf16.msra.mxu1 %v2617_v20  ;;  %2377 = vmatprep.mubr.msk.f32.mxu1 %vm2799_vm0, %v2800_v1  ;;  %v2668_v20 = vpack.c.bf16 %v1985_v15, %v1984_v13  ;;  %v2671_v26 = vpack.c.bf16 %v1987_v22, %v1986_v21  ;;  %v2013_v13 = vld [vmem:[%s3515_s4 + $0x3a0] sm:$0xff]  ;;  %v2014_v15 = vld [vmem:[%s3515_s4 + $0x3a8] sm:$0xff]  ;;  %v2016_v21 = vld [vmem:[%s3515_s4 + $0x3b8] sm:$0xff] }
 0x16b   :  { %2321 = vmatmul.mubr.msk.f32.vlgmr.msra.gmra.mrb[12].mxu0 %vm427_vm1, %v3172_v16  ;;  %2619 = vmatprep.subr.bf16.mxu1 %v2798_v43  ;;  %v2653_v16 = vpack.c.bf16 %v1974_v9, %v1973_v8  ;;  %v2716_v8 = vpack.c.bf16 %v2021_v4, %v2020_v19  ;;  %v2022_v9 = vld [vmem:[%s3515_s4 + $0x3e0] sm:$0xff]  ;;  %v2707_v18 = vpack.c.bf16 %v2014_v15, %v2013_v13 }
 0x16c   :  { %2606 = vmatpush3.bf16.msra.mxu0 %v2605_v24  ;;  %2358 = vmatprep.mubr.msk.f32.mxu0 %vm2799_vm0, %v2800_v1  ;;  %v1977_v24 = vld [vmem:[%s3515_s4 + $0x2a0] sm:$0xff] }
 0x16d   :  { %2607 = vmatprep.subr.bf16.mxu0 %v2798_v43  ;;  %v2659_v29 = vpack.c.bf16 %v1978_v25, %v1977_v24  ;;  %v1752_v24 = vrot.slane %v500_v14, 6  ;;  %v1669_v25 = vrot.slane %v500_v14, 4 }
 0x16e   :  { %2621 = vmatpush3.bf16.msra.mxu1 %v2620_v27  ;;  %v1988_v27 = vld [vmem:[%s3515_s4 + $0x2f0] sm:$0xff] }
 0x16f   :  { %2622 = vmatprep.subr.bf16.mxu1 %v2798_v43  ;;  %v2674_v32 = vpack.c.bf16 %v1989_v28, %v1988_v27 }
 0x170   :  { %2609 = vmatpush3.bf16.msra.mxu0 %v2608_v30  ;;  %v1979_v30 = vld [vmem:[%s3515_s4 + $0x2b0] sm:$0xff] }
 0x171   :  { %2610 = vmatprep.subr.bf16.mxu0 %v2798_v43  ;;  %v2662_v35 = vpack.c.bf16 %v1980_v31, %v1979_v30 }
 0x172   :  { %2624 = vmatpush3.bf16.msra.mxu1 %v2623_v33  ;;  %v2000_v33 = vld [vmem:[%s3515_s4 + $0x340] sm:$0xff] }
 0x173   :  { %2625 = vmatprep.subr.bf16.mxu1 %v2798_v43  ;;  %v2689_v38 = vpack.c.bf16 %v2001_v34, %v2000_v33 }
 0x174   :  { %2612 = vmatpush3.bf16.msra.mxu0 %v2611_v36  ;;  %v1991_v36 = vld [vmem:[%s3515_s4 + $0x300] sm:$0xff] }
 0x175   :  { %2613 = vmatprep.subr.bf16.mxu0 %v2798_v43 }
 0x176   :  { %2627 = vmatpush3.bf16.msra.mxu1 %v2626_v39  ;;  %v1420_v39 = vrot.slane %v3304_v7, 6 }
 0x177   :  { %2640 = vmatprep.subr.bf16.mxu1 %v2798_v43 }
 0x178   :  { %2615 = vmatpush3.bf16.msra.mxu0 %v2614_v42  ;;  %v2677_v42 = vpack.c.bf16 %v1992_v37, %v1991_v36 }
 0x179   :  { %2378 = vmatmul.mubr.msk.f32.vlgmr.msra.gmra.mrb[14].mxu1 %vm427_vm1, %v1088_v47  ;;  %2628 = vmatprep.subr.bf16.mxu0 %v2798_v43  ;;  %v2692_v47 = vpack.c.bf16 %v2003_v41, %v2002_v40 }
 0x17a   :  { %2642 = vmatpush3.bf16.msra.mxu1 %v2641_v46  ;;  %2415 = vmatprep.mubr.msk.f32.mxu1 %vm2799_vm0, %v2800_v1  ;;  %v1994_v46 = vld [vmem:[%s3515_s4 + $0x318] sm:$0xff] }
 0x17b   :  { %2359 = vmatmul.mubr.msk.f32.vlgmr.msra.gmra.mrb[14].mxu0 %vm427_vm1, %v1005_v51  ;;  %2643 = vmatprep.subr.bf16.mxu1 %v2798_v43  ;;  %v1995_v51 = vld [vmem:[%s3515_s4 + $0x320] sm:$0xff] }
 0x17c   :  { %2630 = vmatpush3.bf16.msra.mxu0 %v2629_v50  ;;  %2396 = vmatprep.mubr.msk.f32.mxu0 %vm2799_vm0, %v2800_v1  ;;  %v2680_v50 = vpack.c.bf16 %v1994_v46, %v1993_v45  ;;  %v2683_v57 = vpack.c.bf16 %v1996_v52, %v1995_v51 }
 0x17d   :  { %2631 = vmatprep.subr.bf16.mxu0 %v2798_v43 }
 0x17e   :  { %2645 = vmatpush3.bf16.msra.mxu1 %v2644_v54  ;;  %v2006_v54 = vld [vmem:[%s3515_s4 + $0x370] sm:$0xff] }
 0x17f   :  { %2646 = vmatprep.subr.bf16.mxu1 %v2798_v43  ;;  %v2698_v60 = vpack.c.bf16 %v2007_v55, %v2006_v54 }
 0x180   :  { %2633 = vmatpush3.bf16.msra.mxu0 %v2632_v58  ;;  %v1997_v58 = vld [vmem:[%s3515_s4 + $0x330] sm:$0xff] }
 0x181   :  { %2634 = vmatprep.subr.bf16.mxu0 %v2798_v43 }
 0x182   :  { %2648 = vmatpush3.bf16.msra.mxu1 %v2647_v61  ;;  %v2018_v61 = vld [vmem:[%s3515_s4 + $0x3c0] sm:$0xff] }
 0x183   :  { %2649 = vmatprep.subr.bf16.mxu1 %v2798_v43  ;;  %v2713_v2 = vpack.c.bf16 %v2019_v12, %v2018_v61 }
 0x184   :  { %2636 = vmatpush3.bf16.msra.mxu0 %v2635_v62  ;;  %v2686_v62 = vpack.c.bf16 %v1998_v59, %v1997_v58 }
 0x185   :  { %2637 = vmatprep.subr.bf16.mxu0 %v2798_v43 }
 0x186   :  { %2651 = vmatpush3.bf16.msra.mxu1 %v2650_v3  ;;  %v1586_v3 = vrot.slane %v500_v14, 2 }
 0x187   :  { %2664 = vmatprep.subr.bf16.mxu1 %v2798_v43 }
 0x188   :  { %2639 = vmatpush3.bf16.msra.mxu0 %v2638_v6  ;;  %v2011_v6 = vld [vmem:[%s3515_s4 + $0x390] sm:$0xff] }
 0x189   :  { %2416 = vmatmul.mubr.msk.f32.vlgmr.msra.gmra.mrb[16].mxu1 %vm427_vm1, %v1254_v11  ;;  %2652 = vmatprep.subr.bf16.mxu0 %v2798_v43 }
 0x18a   :  { %2666 = vmatpush3.bf16.msra.mxu1 %v2665_v10  ;;  %2453 = vmatprep.mubr.msk.f32.mxu1 %vm2799_vm0, %v2800_v1  ;;  %v2023_v10 = vld [vmem:[%s3515_s4 + $0x3e8] sm:$0xff] }
 0x18b   :  { %2397 = vmatmul.mubr.msk.f32.vlgmr.msra.gmra.mrb[16].mxu0 %vm427_vm1, %v3304_v7  ;;  %2667 = vmatprep.subr.bf16.mxu1 %v2798_v43  ;;  %v2012_v7 = vld [vmem:[%s3515_s4 + $0x398] sm:$0xff] }
 0x18c   :  { %2654 = vmatpush3.bf16.msra.mxu0 %v2653_v16  ;;  %2434 = vmatprep.mubr.msk.f32.mxu0 %vm2799_vm0, %v2800_v1  ;;  %v2704_v11 = vpack.c.bf16 %v2012_v7, %v2011_v6  ;;  %v2719_v16 = vpack.c.bf16 %v2023_v10, %v2022_v9  ;;  %v2027_v6 = vld [vmem:[%s3516_s5] ss:$0 sm:$0xff] }
 0x18d   :  { %2655 = vmatprep.subr.bf16.mxu0 %v2798_v43 }
 0x18e   :  { %2669 = vmatpush3.bf16.msra.mxu1 %v2668_v20  ;;  %v2015_v20 = vld [vmem:[%s3515_s4 + $0x3b0] sm:$0xff] }
 0x18f   :  { %2670 = vmatprep.subr.bf16.mxu1 %v2798_v43 }
 0x190   :  { %2657 = vmatpush3.bf16.msra.mxu0 %v2656_v23  ;;  %v2710_v23 = vpack.c.bf16 %v2016_v21, %v2015_v20 }
 0x191   :  { %2658 = vmatprep.subr.bf16.mxu0 %v2798_v43 }
 0x192   :  { %2672 = vmatpush3.bf16.msra.mxu1 %v2671_v26 }
 0x193   :  { %2673 = vmatprep.subr.bf16.mxu1 %v2798_v43 }
 0x194   :  { %2660 = vmatpush3.bf16.msra.mxu0 %v2659_v29 }
 0x195   :  { %2661 = vmatprep.subr.bf16.mxu0 %v2798_v43 }
 0x196   :  { %2675 = vmatpush3.bf16.msra.mxu1 %v2674_v32 }
 0x197   :  { %2688 = vmatprep.subr.bf16.mxu1 %v2798_v43 }
 0x198   :  { %2663 = vmatpush3.bf16.msra.mxu0 %v2662_v35 }
 0x199   :  { %2454 = vmatmul.mubr.msk.f32.vlgmr.msra.gmra.mrb[18].mxu1 %vm427_vm1, %v1420_v39  ;;  %2676 = vmatprep.subr.bf16.mxu0 %v2798_v43 }
 0x19a   :  { %2690 = vmatpush3.bf16.msra.mxu1 %v2689_v38  ;;  %2491 = vmatprep.mubr.msk.f32.mxu1 %vm2799_vm0, %v2800_v1 }
 0x19b   :  { %2435 = vmatmul.mubr.msk.f32.vlgmr.msra.gmra.mrb[18].mxu0 %vm427_vm1, %v1337_v44  ;;  %2691 = vmatprep.subr.bf16.mxu1 %v2798_v43 }
 0x19c   :  { %2678 = vmatpush3.bf16.msra.mxu0 %v2677_v42  ;;  %2472 = vmatprep.mubr.msk.f32.mxu0 %vm2799_vm0, %v2800_v1 }
 0x19d   :  { %2679 = vmatprep.subr.bf16.mxu0 %v2798_v43 }
 0x19e   :  { %2693 = vmatpush3.bf16.msra.mxu1 %v2692_v47 }
 0x19f   :  { %2694 = vmatprep.subr.bf16.mxu1 %v2798_v43 }
 0x1a0   :  { %2681 = vmatpush3.bf16.msra.mxu0 %v2680_v50 }
 0x1a1   :  { %2682 = vmatprep.subr.bf16.mxu0 %v2798_v43 }
 0x1a2   :  { %2696 = vmatpush3.bf16.msra.mxu1 %v2695_v53 }
 0x1a3   :  { %2697 = vmatprep.subr.bf16.mxu1 %v2798_v43 }
 0x1a4   :  { %2684 = vmatpush3.bf16.msra.mxu0 %v2683_v57 }
 0x1a5   :  { %2685 = vmatprep.subr.bf16.mxu0 %v2798_v43 }
 0x1a6   :  { %2699 = vmatpush3.bf16.msra.mxu1 %v2698_v60 }
 0x1a7   :  { %2712 = vmatprep.subr.bf16.mxu1 %v2798_v43 }
 0x1a8   :  { %2687 = vmatpush3.bf16.msra.mxu0 %v2686_v62 }
 0x1a9   :  { %2492 = vmatmul.mubr.msk.f32.vlgmr.msra.gmra.mrb[20].mxu1 %vm427_vm1, %v1586_v3  ;;  %2700 = vmatprep.subr.bf16.mxu0 %v2798_v43 }
 0x1aa   :  { %2714 = vmatpush3.bf16.msra.mxu1 %v2713_v2  ;;  %2529 = vmatprep.mubr.msk.f32.mxu1 %vm2799_vm0, %v2800_v1 }
 0x1ab   :  { %2473 = vmatmul.mubr.msk.f32.vlgmr.msra.gmra.mrb[20].mxu0 %vm427_vm1, %v500_v14  ;;  %2715 = vmatprep.subr.bf16.mxu1 %v2798_v43 }
 0x1ac   :  { %2702 = vmatpush3.bf16.msra.mxu0 %v2701_v5  ;;  %2510 = vmatprep.mubr.msk.f32.mxu0 %vm2799_vm0, %v2800_v1  ;;  %v2025_v1 = vld [vmem:[%s3515_s4 + $0x3f8] sm:$0xff] }
 0x1ad   :  { %2703 = vmatprep.subr.bf16.mxu0 %v2798_v43  ;;  %v2722_v22 = vpack.c.bf16 %v2025_v1, %v2024_v17 }
 0x1ae   :  { %2717 = vmatpush3.bf16.msra.mxu1 %v2716_v8 }
 0x1af   :  { %2718 = vmatprep.subr.bf16.mxu1 %v2798_v43 }
 0x1b0   :  { %2705 = vmatpush3.bf16.msra.mxu0 %v2704_v11 }
 0x1b1   :  { %2706 = vmatprep.subr.bf16.mxu0 %v2798_v43 }
 0x1b2   :  { %2720 = vmatpush3.bf16.msra.mxu1 %v2719_v16 }
 0x1b3   :  { %2721 = vmatprep.subr.bf16.mxu1 %v2798_v43 }
 0x1b4   :  { %2708 = vmatpush3.bf16.msra.mxu0 %v2707_v18 }
 0x1b5   :  { %2709 = vmatprep.subr.bf16.mxu0 %v2798_v43 }
 0x1b6   :  { %2723 = vmatpush3.bf16.msra.mxu1 %v2722_v22 }
 0x1b8   :  { %2711 = vmatpush3.bf16.msra.mxu0 %v2710_v23 }
 0x1b9   :  { %2530 = vmatmul.mubr.msk.f32.vlgmr.msra.gmra.mrb[22].mxu1 %vm427_vm1, %v1752_v24 }
 0x1bb   :  { %2511 = vmatmul.mubr.msk.f32.vlgmr.msra.gmra.mrb[22].mxu0 %vm427_vm1, %v1669_v25 }
 0x21c   :  { %v660_v26 = vpop.f32.mrb[8].mxu1 }
 0x21d   :  { %v2265_v27 = vpop.f32.mrb[9].mxu1 }
 0x21e   :  { %v588_v28 = vpop.f32.mrb[8].mxu0 }
 0x21f   :  { %v661_v29 = vadd.f32 %v660_v26, %v588_v28  ;;  %v2246_v30 = vpop.f32.mrb[9].mxu0 }
 0x22c   :  { %v825_v31 = vpop.f32.mrb[10].mxu1 }
 0x22d   :  { %v2303_v32 = vpop.f32.mrb[11].mxu1 }
 0x22e   :  { %v742_v33 = vpop.f32.mrb[10].mxu0 }
 0x22f   :  { %v746_v34 = vadd.f32 %v742_v33, %v661_v29  ;;  %v2284_v35 = vpop.f32.mrb[11].mxu0 }
 0x231   :  { %v829_v36 = vadd.f32 %v825_v31, %v746_v34 }
 0x23c   :  { %v991_v43 = vpop.f32.mrb[12].mxu1 }
 0x23d   :  { %v2341_v37 = vpop.f32.mrb[13].mxu1 }
 0x23e   :  { %v908_v38 = vpop.f32.mrb[12].mxu0 }
 0x23f   :  { %v912_v39 = vadd.f32 %v908_v38, %v829_v36  ;;  %v2322_v40 = vpop.f32.mrb[13].mxu0 }
 0x241   :  { %v995_v41 = vadd.f32 %v991_v43, %v912_v39 }
 0x24c   :  { %v1157_v42 = vpop.f32.mrb[14].mxu1 }
 0x24d   :  { %v2379_v44 = vpop.f32.mrb[15].mxu1 }
 0x24e   :  { %v1074_v45 = vpop.f32.mrb[14].mxu0 }
 0x24f   :  { %v1078_v46 = vadd.f32 %v1074_v45, %v995_v41  ;;  %v2360_v47 = vpop.f32.mrb[15].mxu0 }
 0x251   :  { %v1161_v48 = vadd.f32 %v1157_v42, %v1078_v46 }
 0x25c   :  { %v1323_v49 = vpop.f32.mrb[16].mxu1 }
 0x25d   :  { %v2417_v50 = vpop.f32.mrb[17].mxu1 }
 0x25e   :  { %v1240_v51 = vpop.f32.mrb[16].mxu0 }
 0x25f   :  { %v1244_v52 = vadd.f32 %v1240_v51, %v1161_v48  ;;  %v2398_v53 = vpop.f32.mrb[17].mxu0 }
 0x261   :  { %v1327_v54 = vadd.f32 %v1323_v49, %v1244_v52 }
 0x26c   :  { %v1489_v55 = vpop.f32.mrb[18].mxu1 }
 0x26d   :  { %v2455_v56 = vpop.f32.mrb[19].mxu1 }
 0x26e   :  { %v1406_v57 = vpop.f32.mrb[18].mxu0 }
 0x26f   :  { %v1410_v58 = vadd.f32 %v1406_v57, %v1327_v54  ;;  %v2436_v59 = vpop.f32.mrb[19].mxu0 }
 0x271   :  { %v1493_v60 = vadd.f32 %v1489_v55, %v1410_v58 }
 0x27c   :  { %v1655_v61 = vpop.f32.mrb[20].mxu1 }
 0x27d   :  { %v2493_v12 = vpop.f32.mrb[21].mxu1 }
 0x27e   :  { %v1572_v14 = vpop.f32.mrb[20].mxu0 }
 0x27f   :  { %v1576_v62 = vadd.f32 %v1572_v14, %v1493_v60  ;;  %v2474_v63 = vpop.f32.mrb[21].mxu0 }
 0x281   :  { %v1659_v0 = vadd.f32 %v1655_v61, %v1576_v62 }
 0x28c   :  { %v1821_v2 = vpop.f32.mrb[22].mxu1 }
 0x28d   :  { %v2531_v3 = vpop.f32.mrb[23].mxu1 }
 0x28e   :  { %v1738_v19 = vpop.f32.mrb[22].mxu0 }
 0x28f   :  { %v1742_v4 = vadd.f32 %v1738_v19, %v1659_v0  ;;  %v2512_v5 = vpop.f32.mrb[23].mxu0 }
 0x291   :  { %v1825_v7 = vadd.f32 %v1821_v2, %v1742_v4 }
 0x293   :  { %v1833_v8 = vadd.f32 %v2027_v6, %v1825_v7 }
 0x295   :  { %1835 = vst.msk [vmem:[#allocation2] sm:$0x3] %vm1834_vm6, %v1833_v8 }
 0x296   :  { %2785 = shalt.err (!%p2782_p4)
}
 0x297   :  { %s2786_s17 = scalar_lea.hbm %s3517_s6, 32 }
 0x298   :  { %p2787_p5 = scmp.ne.s32.totalorder %s3517_s6, %s2786_s17  ;;  %p2790_p6 = scmp.lt.u32.totalorder %s2786_s17, %s3517_s6 }
 0x29a   :  { %p2792_p7 = pnand %p2790_p6, %p2787_p5 }
 0x29c   :  { %2795 = shalt.err (!%p2792_p7)
}
 0x29d   :  { %1845 = dma.vmem_to_hbm [thread:$0]  %s1843_s2, 32, %s3517_s6, [#allocation3]  }
 0x29e   :  { %2796 = dma.done.wait [#allocation3], 32  }
 0x29f   :  { %2797 = vsyncadd [#allocation3], 4294967264 }
 0x2a0   :  { %1849 = vsyncpa [#allocation3], 1 }

</bundles_post_ra>
